<compile_context>
chip_gen: v6e
topology: v6e:2x2x1
jax: 0.10.0
libtpu: 0.0.40
codegen_flags: <defaults>
</compile_context>

<pallas_src>
from functools import partial

import jax
import jax.numpy as jnp
from jax.experimental import pallas as pl
from jax.experimental.pallas import tpu as pltpu


def _block_kernel(x_ref, m_ref, w1_ref, b1_ref, w2_ref, b2_ref, o_ref,
                  *, H, W, K, P, nb, res_scale, cast_early):
    HW = H * W
    L = nb * HW

    # Fold the nb images of this grid step into one lane-dense (Cin, nb*HW)
    # slab (VMEM-side concat; the mask makes cross-image bleed impossible).
    if nb == 1:
        xcat = x_ref[0]
    else:
        xcat = jnp.concatenate([x_ref[i] for i in range(nb)], axis=1)
    x_f32 = xcat.astype(jnp.float32)

    taps = [(dy, dx) for dy in range(K) for dx in range(K)]
    shifts = [(-((dy - P) * W + (dx - P))) % L for dy, dx in taps]

    # ---- conv1 (n_feats -> block_feats) + bias + ReLU --------------------
    # Roll/mask the *narrow* input; one fused MXU matmul over the im2col.
    # cast_early: roll in bf16 (halves XLU traffic) when Cin is a multiple of
    # the bf16 sublane tile; otherwise roll/mask in f32 and cast per piece
    # (removes the f32 (K*K*Cin, L) concat temporary either way).
    src = xcat.astype(jnp.bfloat16) if cast_early else x_f32
    pieces = []
    for t, s in enumerate(shifts):
        shifted = src if s == 0 else pltpu.roll(src, shift=s, axis=1)
        masked = shifted * m_ref[t:t + 1, :]              # mask is bf16 {0,1}
        pieces.append(masked.astype(jnp.bfloat16))
    patches = jnp.concatenate(pieces, axis=0)             # (K*K*Cin, L) bf16
    a1 = jnp.dot(w1_ref[...], patches, preferred_element_type=jnp.float32)
    a1 = jnp.maximum(a1 + b1_ref[...], 0.0)               # (Cmid, L) f32
    a1_16 = a1.astype(jnp.bfloat16)

    # ---- conv2 (block_feats -> n_feats) + bias ----------------------------
    # Per-tap matmuls, then roll/mask/accumulate the narrow (Cout, L) partial
    # outputs: XLU/VALU traffic scales with n_feats, not block_feats.
    acc = None
    for t, s in enumerate(shifts):
        part = jnp.dot(w2_ref[t], a1_16, preferred_element_type=jnp.float32)
        if s != 0:
            part = pltpu.roll(part, shift=s, axis=1)
        part = part * m_ref[t:t + 1, :]
        acc = part if acc is None else acc + part
    a2 = acc + b2_ref[...]                                 # (Cout, L) f32

    # residual:  out = body(x) * res_scale + x   (f32)
    if res_scale != 1.0:
        res = a2 * res_scale + x_f32
    else:
        res = a2 + x_f32

    # lane-dense per-image stores (HW is a multiple of 128 whenever nb > 1)
    if nb == 1:
        o_ref[0] = res.astype(o_ref.dtype)
    else:
        for i in range(nb):
            o_ref[i] = res[:, i * HW:(i + 1) * HW].astype(o_ref.dtype)


def _border_mask(H, W, K, P):
    # (K*K, H*W) mask: 1 where the (dy,dx) tap at this *output* pixel lands
    # inside the image (SAME zero padding).  Also zeroes every tap whose
    # flattened roll would wrap across a row / image boundary.
    h = jnp.arange(H).reshape(H, 1)
    w = jnp.arange(W).reshape(1, W)
    rows = []
    for dy in range(K):
        for dx in range(K):
            valid = ((h + dy - P >= 0) & (h + dy - P < H) &
                     (w + dx - P >= 0) & (w + dx - P < W))
            rows.append(valid.reshape(1, H * W))
    return jnp.concatenate(rows, axis=0)


def _vmem_bytes_estimate(nb, Cin, Cmid, Cout, HW, K):
    L = nb * HW
    est = 0
    est += 2 * (nb * Cin * HW * 4 + nb * Cout * HW * 4)    # double-buffered in/out blocks
    est += K * K * L * 2                                    # border mask (bf16)
    est += Cin * L * (4 + 2) + K * K * Cin * L * 2          # x slab (f32+bf16) + im2col (bf16)
    est += Cmid * L * (4 + 2)                               # a1 f32 + bf16
    est += 3 * Cout * L * 4                                 # partial / acc / residual
    est += (Cmid * K * K * Cin + K * K * Cout * Cmid) * 2   # bf16 weights
    est += (Cmid + Cout) * 4                                # biases
    return est


def _pick_nb(N, HW, Cin, Cmid, Cout, K,
             budget_bytes=20 * 2**20, max_lanes=16384):
    # Largest divisor of N such that the folded (C, nb*HW) live set stays
    # well inside scoped VMEM and the per-image output slices stay 128-aligned.
    if HW % 128 != 0:
        return 1
    best = 1
    for nb in range(1, N + 1):
        if N % nb:
            continue
        if nb * HW > max_lanes:
            break
        if _vmem_bytes_estimate(nb, Cin, Cmid, Cout, HW, K) > budget_bytes:
            break
        best = nb
    return best


def prepare_block_params(w1, b1, w2, b2):
    """One-time host-side prep (hoisted out of the forward hot path):
    tap-major bf16 weight matrices + f32 column biases."""
    Cmid, Cin, K, K2 = w1.shape
    Cout, Cmid2, K3, K4 = w2.shape
    assert K == K2 == K3 == K4 and Cmid2 == Cmid
    # conv1: (out, in, kh, kw) -> (out, kh, kw, in) -> (out, K*K*in)
    w1f = jnp.transpose(w1, (0, 2, 3, 1)).reshape(Cmid, K * K * Cin).astype(jnp.bfloat16)
    # conv2: per-tap (K*K, Cout, Cmid) matrices for the roll-the-output form
    w2t = jnp.transpose(w2, (2, 3, 0, 1)).reshape(K * K, Cout, Cmid).astype(jnp.bfloat16)
    b1c = b1.reshape(Cmid, 1).astype(jnp.float32)
    b2c = b2.reshape(Cout, 1).astype(jnp.float32)
    return {"w1f": w1f, "w2t": w2t, "b1c": b1c, "b2c": b2c}


@partial(jax.jit, static_argnames=("res_scale",))
def wdsr_block_apply(x_nchw, params, res_scale=1.0):
    N, Cin, H, W = x_nchw.shape
    w1f, w2t = params["w1f"], params["w2t"]
    b1c, b2c = params["b1c"], params["b2c"]
    Cmid = w1f.shape[0]
    KK, Cout, _ = w2t.shape
    K = int(round(KK ** 0.5))
    assert K * K == KK and w1f.shape[1] == K * K * Cin
    assert Cout == Cin, "WDSR residual block requires conv2 out == n_feats"
    P = K // 2
    HW = H * W

    nb = _pick_nb(N, HW, Cin, Cmid, Cout, K)
    L = nb * HW

    # Stay in (N, C, H*W): free reshape, no transposes, no host-side padding.
    x3 = x_nchw.reshape(N, Cin, HW)

    # Border mask tiled across the nb images folded into the lane axis.
    # bf16 halves its HBM/VMEM footprint; {0,1} is exact. Constant-folds under jit.
    mask = jnp.tile(_border_mask(H, W, K, P), (1, nb)).astype(jnp.bfloat16)

    cast_early = (Cin % 16 == 0)   # bf16 rolls only when sublane-tile aligned

    kernel = partial(_block_kernel, H=H, W=W, K=K, P=P, nb=nb,
                     res_scale=float(res_scale), cast_early=cast_early)

    vmem_limit = int(min(64 * 2**20,
                         max(32 * 2**20,
                             2 * _vmem_bytes_estimate(nb, Cin, Cmid, Cout, HW, K))))

    # TODO(synk): for production-size images (v7x: 64 MiB physical VMEM) add a
    # spatial row-band grid axis with a P-row halo so the per-step live set
    # stays within budget and both v7x TensorCores stay fed.
    out3 = pl.pallas_call(
        kernel,
        out_shape=jax.ShapeDtypeStruct((N, Cout, HW), x_nchw.dtype),
        grid=(N // nb,),
        in_specs=[
            pl.BlockSpec((nb, Cin, HW), lambda g: (g, 0, 0)),
            pl.BlockSpec((K * K, L), lambda g: (0, 0)),
            pl.BlockSpec((Cmid, K * K * Cin), lambda g: (0, 0)),
            pl.BlockSpec((Cmid, 1), lambda g: (0, 0)),
            pl.BlockSpec((K * K, Cout, Cmid), lambda g: (0, 0, 0)),
            pl.BlockSpec((Cout, 1), lambda g: (0, 0)),
        ],
        out_specs=pl.BlockSpec((nb, Cout, HW), lambda g: (g, 0, 0)),
        compiler_params=pltpu.CompilerParams(
            dimension_semantics=("parallel",),
            vmem_limit_bytes=vmem_limit),
    )(x3, mask, w1f, b1c, w2t, b2c)

    return out3.reshape(N, Cout, H, W)                      # already NCHW


def wdsr_block(x_nchw, w1, b1, w2, b2, res_scale=1.0):
    """Convenience one-shot wrapper (prep + apply)."""
    return wdsr_block_apply(x_nchw, prepare_block_params(w1, b1, w2, b2),
                            res_scale=float(res_scale))


if __name__ == "__main__":
    # Small shapes consistent with Block(n_feats, kernel_size=3, block_feats)
    n_feats, block_feats, K = 8, 32, 3
    N, H, W = 2, 16, 16
    res_scale = 1.0

    key = jax.random.PRNGKey(0)
    ks = jax.random.split(key, 7)
    x = jax.random.normal(ks[0], (N, n_feats, H, W), jnp.float32)

    # Deterministic weight-norm parameterization: w = g * v / ||v||_(in,kh,kw)
    v1 = 0.1 * jax.random.normal(ks[1], (block_feats, n_feats, K, K), jnp.float32)
    g1 = 1.0 + 0.1 * jax.random.normal(ks[2], (block_feats,), jnp.float32)
    b1 = 0.01 * jax.random.normal(ks[3], (block_feats,), jnp.float32)
    v2 = 0.1 * jax.random.normal(ks[4], (n_feats, block_feats, K, K), jnp.float32)
    g2 = 1.0 + 0.1 * jax.random.normal(ks[5], (n_feats,), jnp.float32)
    b2 = 0.01 * jax.random.normal(ks[6], (n_feats,), jnp.float32)

    def weight_norm(v, g):
        nrm = jnp.sqrt(jnp.sum(v * v, axis=(1, 2, 3), keepdims=True))
        return v * (g.reshape(-1, 1, 1, 1) / nrm)

    w1 = weight_norm(v1, g1)
    w2 = weight_norm(v2, g2)

    # Hoisted one-time weight prep; jitted apply is the hot path.
    params = jax.block_until_ready(prepare_block_params(w1, b1, w2, b2))
    out = jax.block_until_ready(wdsr_block_apply(x, params, res_scale=res_scale))

    # Pure-JAX f32 reference (NCHW, SAME padding).
    def conv_ref(xx, w, b):
        y = jax.lax.conv_general_dilated(
            xx, w, window_strides=(1, 1), padding="SAME",
            dimension_numbers=("NCHW", "OIHW", "NCHW"))
        return y + b.reshape(1, -1, 1, 1)

    ref = conv_ref(jnp.maximum(conv_ref(x, w1, b1), 0.0), w2, b2) * res_scale + x

    assert out.shape == ref.shape and out.dtype == ref.dtype
    err = float(jnp.max(jnp.abs(out - ref)))
    # bf16 MXU operands (f32 accumulation) vs f32 reference -> relaxed tolerance.
    assert err < 5e-2, f"max abs err {err}"
    print("KERNEL_OK")
</pallas_src>

<mosaic_0001>
module attributes {stable_mosaic.version = 11 : i64} {
  func.func @_block_kernel(%arg0: i32, %arg1: memref<2x8x256xf32, #tpu.memory_space<vmem>>, %arg2: memref<9x512xbf16, #tpu.memory_space<vmem>>, %arg3: memref<32x72xbf16, #tpu.memory_space<vmem>>, %arg4: memref<32x1xf32, #tpu.memory_space<vmem>>, %arg5: memref<9x8x32xbf16, #tpu.memory_space<vmem>>, %arg6: memref<8x1xf32, #tpu.memory_space<vmem>>, %arg7: memref<2x8x256xf32, #tpu.memory_space<vmem>>) attributes {dimension_semantics = [#tpu.dimension_semantics<parallel>], iteration_bounds = array<i64: 1>, scalar_prefetch = 0 : i64, scratch_operands = 0 : i64, tpu.core_type = #tpu.core_type<tc>, window_params = [{transform_indices = @transform_0, window_bounds = array<i64: 2, 8, 256>}, {pipeline_mode = #tpu.pipeline_mode<synchronous>, transform_indices = @transform_1, window_bounds = array<i64: 9, 512>}, {pipeline_mode = #tpu.pipeline_mode<synchronous>, transform_indices = @transform_2, window_bounds = array<i64: 32, 72>}, {pipeline_mode = #tpu.pipeline_mode<synchronous>, transform_indices = @transform_3, window_bounds = array<i64: 32, 1>}, {pipeline_mode = #tpu.pipeline_mode<synchronous>, transform_indices = @transform_4, window_bounds = array<i64: 9, 8, 32>}, {pipeline_mode = #tpu.pipeline_mode<synchronous>, transform_indices = @transform_5, window_bounds = array<i64: 8, 1>}, {transform_indices = @transform_6, window_bounds = array<i64: 2, 8, 256>}]} {
    %c0 = arith.constant 0 : index
    %c0_0 = arith.constant 0 : index
    %c0_1 = arith.constant 0 : index
    %0 = vector.load %arg1[%c0, %c0_0, %c0_1] : memref<2x8x256xf32, #tpu.memory_space<vmem>>, vector<1x8x256xf32>
    %1 = vector.shape_cast %0 : vector<1x8x256xf32> to vector<8x256xf32>
    %c1 = arith.constant 1 : index
    %c0_2 = arith.constant 0 : index
    %c0_3 = arith.constant 0 : index
    %2 = vector.load %arg1[%c1, %c0_2, %c0_3] : memref<2x8x256xf32, #tpu.memory_space<vmem>>, vector<1x8x256xf32>
    %3 = vector.shape_cast %2 : vector<1x8x256xf32> to vector<8x256xf32>
    %4 = tpu.concatenate %1, %3 in 1 : vector<8x256xf32>, vector<8x256xf32> -> vector<8x512xf32>
    %c17_i32 = arith.constant 17 : i32
    %5 = tpu.dynamic_rotate %4 by %c17_i32 dim 1 : vector<8x512xf32>, i32 -> vector<8x512xf32>
    %c0_4 = arith.constant 0 : index
    %c0_5 = arith.constant 0 : index
    %6 = vector.load %arg2[%c0_4, %c0_5] : memref<9x512xbf16, #tpu.memory_space<vmem>>, vector<1x512xbf16>
    %7 = arith.extf %6 : vector<1x512xbf16> to vector<1x512xf32>
    %8 = vector.broadcast %7 : vector<1x512xf32> to vector<8x512xf32>
    %9 = arith.mulf %5, %8 : vector<8x512xf32>
    %10 = arith.truncf %9 : vector<8x512xf32> to vector<8x512xbf16>
    %c16_i32 = arith.constant 16 : i32
    %11 = tpu.dynamic_rotate %4 by %c16_i32 dim 1 : vector<8x512xf32>, i32 -> vector<8x512xf32>
    %c1_6 = arith.constant 1 : index
    %c0_7 = arith.constant 0 : index
    %12 = vector.load %arg2[%c1_6, %c0_7] : memref<9x512xbf16, #tpu.memory_space<vmem>>, vector<1x512xbf16>
    %13 = arith.extf %12 : vector<1x512xbf16> to vector<1x512xf32>
    %14 = vector.broadcast %13 : vector<1x512xf32> to vector<8x512xf32>
    %15 = arith.mulf %11, %14 : vector<8x512xf32>
    %16 = arith.truncf %15 : vector<8x512xf32> to vector<8x512xbf16>
    %c15_i32 = arith.constant 15 : i32
    %17 = tpu.dynamic_rotate %4 by %c15_i32 dim 1 : vector<8x512xf32>, i32 -> vector<8x512xf32>
    %c2 = arith.constant 2 : index
    %c0_8 = arith.constant 0 : index
    %18 = vector.load %arg2[%c2, %c0_8] : memref<9x512xbf16, #tpu.memory_space<vmem>>, vector<1x512xbf16>
    %19 = arith.extf %18 : vector<1x512xbf16> to vector<1x512xf32>
    %20 = vector.broadcast %19 : vector<1x512xf32> to vector<8x512xf32>
    %21 = arith.mulf %17, %20 : vector<8x512xf32>
    %22 = arith.truncf %21 : vector<8x512xf32> to vector<8x512xbf16>
    %c1_i32 = arith.constant 1 : i32
    %23 = tpu.dynamic_rotate %4 by %c1_i32 dim 1 : vector<8x512xf32>, i32 -> vector<8x512xf32>
    %c3 = arith.constant 3 : index
    %c0_9 = arith.constant 0 : index
    %24 = vector.load %arg2[%c3, %c0_9] : memref<9x512xbf16, #tpu.memory_space<vmem>>, vector<1x512xbf16>
    %25 = arith.extf %24 : vector<1x512xbf16> to vector<1x512xf32>
    %26 = vector.broadcast %25 : vector<1x512xf32> to vector<8x512xf32>
    %27 = arith.mulf %23, %26 : vector<8x512xf32>
    %28 = arith.truncf %27 : vector<8x512xf32> to vector<8x512xbf16>
    %c4 = arith.constant 4 : index
    %c0_10 = arith.constant 0 : index
    %29 = vector.load %arg2[%c4, %c0_10] : memref<9x512xbf16, #tpu.memory_space<vmem>>, vector<1x512xbf16>
    %30 = arith.extf %29 : vector<1x512xbf16> to vector<1x512xf32>
    %31 = vector.broadcast %30 : vector<1x512xf32> to vector<8x512xf32>
    %32 = arith.mulf %4, %31 : vector<8x512xf32>
    %33 = arith.truncf %32 : vector<8x512xf32> to vector<8x512xbf16>
    %c511_i32 = arith.constant 511 : i32
    %34 = tpu.dynamic_rotate %4 by %c511_i32 dim 1 : vector<8x512xf32>, i32 -> vector<8x512xf32>
    %c5 = arith.constant 5 : index
    %c0_11 = arith.constant 0 : index
    %35 = vector.load %arg2[%c5, %c0_11] : memref<9x512xbf16, #tpu.memory_space<vmem>>, vector<1x512xbf16>
    %36 = arith.extf %35 : vector<1x512xbf16> to vector<1x512xf32>
    %37 = vector.broadcast %36 : vector<1x512xf32> to vector<8x512xf32>
    %38 = arith.mulf %34, %37 : vector<8x512xf32>
    %39 = arith.truncf %38 : vector<8x512xf32> to vector<8x512xbf16>
    %c497_i32 = arith.constant 497 : i32
    %40 = tpu.dynamic_rotate %4 by %c497_i32 dim 1 : vector<8x512xf32>, i32 -> vector<8x512xf32>
    %c6 = arith.constant 6 : index
    %c0_12 = arith.constant 0 : index
    %41 = vector.load %arg2[%c6, %c0_12] : memref<9x512xbf16, #tpu.memory_space<vmem>>, vector<1x512xbf16>
    %42 = arith.extf %41 : vector<1x512xbf16> to vector<1x512xf32>
    %43 = vector.broadcast %42 : vector<1x512xf32> to vector<8x512xf32>
    %44 = arith.mulf %40, %43 : vector<8x512xf32>
    %45 = arith.truncf %44 : vector<8x512xf32> to vector<8x512xbf16>
    %c496_i32 = arith.constant 496 : i32
    %46 = tpu.dynamic_rotate %4 by %c496_i32 dim 1 : vector<8x512xf32>, i32 -> vector<8x512xf32>
    %c7 = arith.constant 7 : index
    %c0_13 = arith.constant 0 : index
    %47 = vector.load %arg2[%c7, %c0_13] : memref<9x512xbf16, #tpu.memory_space<vmem>>, vector<1x512xbf16>
    %48 = arith.extf %47 : vector<1x512xbf16> to vector<1x512xf32>
    %49 = vector.broadcast %48 : vector<1x512xf32> to vector<8x512xf32>
    %50 = arith.mulf %46, %49 : vector<8x512xf32>
    %51 = arith.truncf %50 : vector<8x512xf32> to vector<8x512xbf16>
    %c495_i32 = arith.constant 495 : i32
    %52 = tpu.dynamic_rotate %4 by %c495_i32 dim 1 : vector<8x512xf32>, i32 -> vector<8x512xf32>
    %c8 = arith.constant 8 : index
    %c0_14 = arith.constant 0 : index
    %53 = vector.load %arg2[%c8, %c0_14] : memref<9x512xbf16, #tpu.memory_space<vmem>>, vector<1x512xbf16>
    %54 = arith.extf %53 : vector<1x512xbf16> to vector<1x512xf32>
    %55 = vector.broadcast %54 : vector<1x512xf32> to vector<8x512xf32>
    %56 = arith.mulf %52, %55 : vector<8x512xf32>
    %57 = arith.truncf %56 : vector<8x512xf32> to vector<8x512xbf16>
    %58 = tpu.concatenate %10, %16, %22, %28, %33, %39, %45, %51, %57 in 0 : vector<8x512xbf16>, vector<8x512xbf16>, vector<8x512xbf16>, vector<8x512xbf16>, vector<8x512xbf16>, vector<8x512xbf16>, vector<8x512xbf16>, vector<8x512xbf16>, vector<8x512xbf16> -> vector<72x512xbf16>
    %c0_15 = arith.constant 0 : index
    %c0_16 = arith.constant 0 : index
    %59 = vector.load %arg3[%c0_15, %c0_16] : memref<32x72xbf16, #tpu.memory_space<vmem>>, vector<32x72xbf16>
    %cst = arith.constant dense<0.000000e+00> : vector<32x512xf32>
    %60 = tpu.matmul %59, %58, %cst {dimension_numbers = #tpu.dot_dimension_numbers<[1], [0], [0], [1], [0, 0, 1, 1], [], []>} : vector<32x72xbf16>, vector<72x512xbf16>, vector<32x512xf32> -> vector<32x512xf32>
    %c0_17 = arith.constant 0 : index
    %c0_18 = arith.constant 0 : index
    %61 = vector.load %arg4[%c0_17, %c0_18] : memref<32x1xf32, #tpu.memory_space<vmem>>, vector<32x1xf32>
    %62 = vector.broadcast %61 : vector<32x1xf32> to vector<32x512xf32>
    %63 = arith.addf %60, %62 : vector<32x512xf32>
    %cst_19 = arith.constant 0.000000e+00 : f32
    %64 = vector.broadcast %cst_19 : f32 to vector<32x512xf32>
    %65 = arith.maximumf %63, %64 : vector<32x512xf32>
    %66 = arith.truncf %65 : vector<32x512xf32> to vector<32x512xbf16>
    %c0_20 = arith.constant 0 : index
    %c0_21 = arith.constant 0 : index
    %c0_22 = arith.constant 0 : index
    %67 = vector.load %arg5[%c0_20, %c0_21, %c0_22] : memref<9x8x32xbf16, #tpu.memory_space<vmem>>, vector<1x8x32xbf16>
    %68 = vector.shape_cast %67 : vector<1x8x32xbf16> to vector<8x32xbf16>
    %cst_23 = arith.constant dense<0.000000e+00> : vector<8x512xf32>
    %69 = tpu.matmul %68, %66, %cst_23 {dimension_numbers = #tpu.dot_dimension_numbers<[1], [0], [0], [1], [0, 0, 1, 1], [], []>} : vector<8x32xbf16>, vector<32x512xbf16>, vector<8x512xf32> -> vector<8x512xf32>
    %c17_i32_24 = arith.constant 17 : i32
    %70 = tpu.dynamic_rotate %69 by %c17_i32_24 dim 1 : vector<8x512xf32>, i32 -> vector<8x512xf32>
    %c0_25 = arith.constant 0 : index
    %c0_26 = arith.constant 0 : index
    %71 = vector.load %arg2[%c0_25, %c0_26] : memref<9x512xbf16, #tpu.memory_space<vmem>>, vector<1x512xbf16>
    %72 = arith.extf %71 : vector<1x512xbf16> to vector<1x512xf32>
    %73 = vector.broadcast %72 : vector<1x512xf32> to vector<8x512xf32>
    %74 = arith.mulf %70, %73 : vector<8x512xf32>
    %c1_27 = arith.constant 1 : index
    %c0_28 = arith.constant 0 : index
    %c0_29 = arith.constant 0 : index
    %75 = vector.load %arg5[%c1_27, %c0_28, %c0_29] : memref<9x8x32xbf16, #tpu.memory_space<vmem>>, vector<1x8x32xbf16>
    %76 = vector.shape_cast %75 : vector<1x8x32xbf16> to vector<8x32xbf16>
    %cst_30 = arith.constant dense<0.000000e+00> : vector<8x512xf32>
    %77 = tpu.matmul %76, %66, %cst_30 {dimension_numbers = #tpu.dot_dimension_numbers<[1], [0], [0], [1], [0, 0, 1, 1], [], []>} : vector<8x32xbf16>, vector<32x512xbf16>, vector<8x512xf32> -> vector<8x512xf32>
    %c16_i32_31 = arith.constant 16 : i32
    %78 = tpu.dynamic_rotate %77 by %c16_i32_31 dim 1 : vector<8x512xf32>, i32 -> vector<8x512xf32>
    %c1_32 = arith.constant 1 : index
    %c0_33 = arith.constant 0 : index
    %79 = vector.load %arg2[%c1_32, %c0_33] : memref<9x512xbf16, #tpu.memory_space<vmem>>, vector<1x512xbf16>
    %80 = arith.extf %79 : vector<1x512xbf16> to vector<1x512xf32>
    %81 = vector.broadcast %80 : vector<1x512xf32> to vector<8x512xf32>
    %82 = arith.mulf %78, %81 : vector<8x512xf32>
    %83 = arith.addf %74, %82 : vector<8x512xf32>
    %c2_34 = arith.constant 2 : index
    %c0_35 = arith.constant 0 : index
    %c0_36 = arith.constant 0 : index
    %84 = vector.load %arg5[%c2_34, %c0_35, %c0_36] : memref<9x8x32xbf16, #tpu.memory_space<vmem>>, vector<1x8x32xbf16>
    %85 = vector.shape_cast %84 : vector<1x8x32xbf16> to vector<8x32xbf16>
    %cst_37 = arith.constant dense<0.000000e+00> : vector<8x512xf32>
    %86 = tpu.matmul %85, %66, %cst_37 {dimension_numbers = #tpu.dot_dimension_numbers<[1], [0], [0], [1], [0, 0, 1, 1], [], []>} : vector<8x32xbf16>, vector<32x512xbf16>, vector<8x512xf32> -> vector<8x512xf32>
    %c15_i32_38 = arith.constant 15 : i32
    %87 = tpu.dynamic_rotate %86 by %c15_i32_38 dim 1 : vector<8x512xf32>, i32 -> vector<8x512xf32>
    %c2_39 = arith.constant 2 : index
    %c0_40 = arith.constant 0 : index
    %88 = vector.load %arg2[%c2_39, %c0_40] : memref<9x512xbf16, #tpu.memory_space<vmem>>, vector<1x512xbf16>
    %89 = arith.extf %88 : vector<1x512xbf16> to vector<1x512xf32>
    %90 = vector.broadcast %89 : vector<1x512xf32> to vector<8x512xf32>
    %91 = arith.mulf %87, %90 : vector<8x512xf32>
    %92 = arith.addf %83, %91 : vector<8x512xf32>
    %c3_41 = arith.constant 3 : index
    %c0_42 = arith.constant 0 : index
    %c0_43 = arith.constant 0 : index
    %93 = vector.load %arg5[%c3_41, %c0_42, %c0_43] : memref<9x8x32xbf16, #tpu.memory_space<vmem>>, vector<1x8x32xbf16>
    %94 = vector.shape_cast %93 : vector<1x8x32xbf16> to vector<8x32xbf16>
    %cst_44 = arith.constant dense<0.000000e+00> : vector<8x512xf32>
    %95 = tpu.matmul %94, %66, %cst_44 {dimension_numbers = #tpu.dot_dimension_numbers<[1], [0], [0], [1], [0, 0, 1, 1], [], []>} : vector<8x32xbf16>, vector<32x512xbf16>, vector<8x512xf32> -> vector<8x512xf32>
    %c1_i32_45 = arith.constant 1 : i32
    %96 = tpu.dynamic_rotate %95 by %c1_i32_45 dim 1 : vector<8x512xf32>, i32 -> vector<8x512xf32>
    %c3_46 = arith.constant 3 : index
    %c0_47 = arith.constant 0 : index
    %97 = vector.load %arg2[%c3_46, %c0_47] : memref<9x512xbf16, #tpu.memory_space<vmem>>, vector<1x512xbf16>
    %98 = arith.extf %97 : vector<1x512xbf16> to vector<1x512xf32>
    %99 = vector.broadcast %98 : vector<1x512xf32> to vector<8x512xf32>
    %100 = arith.mulf %96, %99 : vector<8x512xf32>
    %101 = arith.addf %92, %100 : vector<8x512xf32>
    %c4_48 = arith.constant 4 : index
    %c0_49 = arith.constant 0 : index
    %c0_50 = arith.constant 0 : index
    %102 = vector.load %arg5[%c4_48, %c0_49, %c0_50] : memref<9x8x32xbf16, #tpu.memory_space<vmem>>, vector<1x8x32xbf16>
    %103 = vector.shape_cast %102 : vector<1x8x32xbf16> to vector<8x32xbf16>
    %cst_51 = arith.constant dense<0.000000e+00> : vector<8x512xf32>
    %104 = tpu.matmul %103, %66, %cst_51 {dimension_numbers = #tpu.dot_dimension_numbers<[1], [0], [0], [1], [0, 0, 1, 1], [], []>} : vector<8x32xbf16>, vector<32x512xbf16>, vector<8x512xf32> -> vector<8x512xf32>
    %c4_52 = arith.constant 4 : index
    %c0_53 = arith.constant 0 : index
    %105 = vector.load %arg2[%c4_52, %c0_53] : memref<9x512xbf16, #tpu.memory_space<vmem>>, vector<1x512xbf16>
    %106 = arith.extf %105 : vector<1x512xbf16> to vector<1x512xf32>
    %107 = vector.broadcast %106 : vector<1x512xf32> to vector<8x512xf32>
    %108 = arith.mulf %104, %107 : vector<8x512xf32>
    %109 = arith.addf %101, %108 : vector<8x512xf32>
    %c5_54 = arith.constant 5 : index
    %c0_55 = arith.constant 0 : index
    %c0_56 = arith.constant 0 : index
    %110 = vector.load %arg5[%c5_54, %c0_55, %c0_56] : memref<9x8x32xbf16, #tpu.memory_space<vmem>>, vector<1x8x32xbf16>
    %111 = vector.shape_cast %110 : vector<1x8x32xbf16> to vector<8x32xbf16>
    %cst_57 = arith.constant dense<0.000000e+00> : vector<8x512xf32>
    %112 = tpu.matmul %111, %66, %cst_57 {dimension_numbers = #tpu.dot_dimension_numbers<[1], [0], [0], [1], [0, 0, 1, 1], [], []>} : vector<8x32xbf16>, vector<32x512xbf16>, vector<8x512xf32> -> vector<8x512xf32>
    %c511_i32_58 = arith.constant 511 : i32
    %113 = tpu.dynamic_rotate %112 by %c511_i32_58 dim 1 : vector<8x512xf32>, i32 -> vector<8x512xf32>
    %c5_59 = arith.constant 5 : index
    %c0_60 = arith.constant 0 : index
    %114 = vector.load %arg2[%c5_59, %c0_60] : memref<9x512xbf16, #tpu.memory_space<vmem>>, vector<1x512xbf16>
    %115 = arith.extf %114 : vector<1x512xbf16> to vector<1x512xf32>
    %116 = vector.broadcast %115 : vector<1x512xf32> to vector<8x512xf32>
    %117 = arith.mulf %113, %116 : vector<8x512xf32>
    %118 = arith.addf %109, %117 : vector<8x512xf32>
    %c6_61 = arith.constant 6 : index
    %c0_62 = arith.constant 0 : index
    %c0_63 = arith.constant 0 : index
    %119 = vector.load %arg5[%c6_61, %c0_62, %c0_63] : memref<9x8x32xbf16, #tpu.memory_space<vmem>>, vector<1x8x32xbf16>
    %120 = vector.shape_cast %119 : vector<1x8x32xbf16> to vector<8x32xbf16>
    %cst_64 = arith.constant dense<0.000000e+00> : vector<8x512xf32>
    %121 = tpu.matmul %120, %66, %cst_64 {dimension_numbers = #tpu.dot_dimension_numbers<[1], [0], [0], [1], [0, 0, 1, 1], [], []>} : vector<8x32xbf16>, vector<32x512xbf16>, vector<8x512xf32> -> vector<8x512xf32>
    %c497_i32_65 = arith.constant 497 : i32
    %122 = tpu.dynamic_rotate %121 by %c497_i32_65 dim 1 : vector<8x512xf32>, i32 -> vector<8x512xf32>
    %c6_66 = arith.constant 6 : index
    %c0_67 = arith.constant 0 : index
    %123 = vector.load %arg2[%c6_66, %c0_67] : memref<9x512xbf16, #tpu.memory_space<vmem>>, vector<1x512xbf16>
    %124 = arith.extf %123 : vector<1x512xbf16> to vector<1x512xf32>
    %125 = vector.broadcast %124 : vector<1x512xf32> to vector<8x512xf32>
    %126 = arith.mulf %122, %125 : vector<8x512xf32>
    %127 = arith.addf %118, %126 : vector<8x512xf32>
    %c7_68 = arith.constant 7 : index
    %c0_69 = arith.constant 0 : index
    %c0_70 = arith.constant 0 : index
    %128 = vector.load %arg5[%c7_68, %c0_69, %c0_70] : memref<9x8x32xbf16, #tpu.memory_space<vmem>>, vector<1x8x32xbf16>
    %129 = vector.shape_cast %128 : vector<1x8x32xbf16> to vector<8x32xbf16>
    %cst_71 = arith.constant dense<0.000000e+00> : vector<8x512xf32>
    %130 = tpu.matmul %129, %66, %cst_71 {dimension_numbers = #tpu.dot_dimension_numbers<[1], [0], [0], [1], [0, 0, 1, 1], [], []>} : vector<8x32xbf16>, vector<32x512xbf16>, vector<8x512xf32> -> vector<8x512xf32>
    %c496_i32_72 = arith.constant 496 : i32
    %131 = tpu.dynamic_rotate %130 by %c496_i32_72 dim 1 : vector<8x512xf32>, i32 -> vector<8x512xf32>
    %c7_73 = arith.constant 7 : index
    %c0_74 = arith.constant 0 : index
    %132 = vector.load %arg2[%c7_73, %c0_74] : memref<9x512xbf16, #tpu.memory_space<vmem>>, vector<1x512xbf16>
    %133 = arith.extf %132 : vector<1x512xbf16> to vector<1x512xf32>
    %134 = vector.broadcast %133 : vector<1x512xf32> to vector<8x512xf32>
    %135 = arith.mulf %131, %134 : vector<8x512xf32>
    %136 = arith.addf %127, %135 : vector<8x512xf32>
    %c8_75 = arith.constant 8 : index
    %c0_76 = arith.constant 0 : index
    %c0_77 = arith.constant 0 : index
    %137 = vector.load %arg5[%c8_75, %c0_76, %c0_77] : memref<9x8x32xbf16, #tpu.memory_space<vmem>>, vector<1x8x32xbf16>
    %138 = vector.shape_cast %137 : vector<1x8x32xbf16> to vector<8x32xbf16>
    %cst_78 = arith.constant dense<0.000000e+00> : vector<8x512xf32>
    %139 = tpu.matmul %138, %66, %cst_78 {dimension_numbers = #tpu.dot_dimension_numbers<[1], [0], [0], [1], [0, 0, 1, 1], [], []>} : vector<8x32xbf16>, vector<32x512xbf16>, vector<8x512xf32> -> vector<8x512xf32>
    %c495_i32_79 = arith.constant 495 : i32
    %140 = tpu.dynamic_rotate %139 by %c495_i32_79 dim 1 : vector<8x512xf32>, i32 -> vector<8x512xf32>
    %c8_80 = arith.constant 8 : index
    %c0_81 = arith.constant 0 : index
    %141 = vector.load %arg2[%c8_80, %c0_81] : memref<9x512xbf16, #tpu.memory_space<vmem>>, vector<1x512xbf16>
    %142 = arith.extf %141 : vector<1x512xbf16> to vector<1x512xf32>
    %143 = vector.broadcast %142 : vector<1x512xf32> to vector<8x512xf32>
    %144 = arith.mulf %140, %143 : vector<8x512xf32>
    %145 = arith.addf %136, %144 : vector<8x512xf32>
    %c0_82 = arith.constant 0 : index
    %c0_83 = arith.constant 0 : index
    %146 = vector.load %arg6[%c0_82, %c0_83] : memref<8x1xf32, #tpu.memory_space<vmem>>, vector<8x1xf32>
    %147 = vector.broadcast %146 : vector<8x1xf32> to vector<8x512xf32>
    %148 = arith.addf %145, %147 : vector<8x512xf32>
    %149 = arith.addf %148, %4 : vector<8x512xf32>
    %150 = vector.extract_strided_slice %149 {offsets = [0, 0], sizes = [8, 256], strides = [1, 1]} : vector<8x512xf32> to vector<8x256xf32>
    %c0_84 = arith.constant 0 : index
    %c0_85 = arith.constant 0 : index
    %c0_86 = arith.constant 0 : index
    %151 = vector.load %arg7[%c0_84, %c0_85, %c0_86] : memref<2x8x256xf32, #tpu.memory_space<vmem>>, vector<1x8x256xf32>
    %152 = vector.shape_cast %151 : vector<1x8x256xf32> to vector<8x256xf32>
    %153 = vector.shape_cast %150 : vector<8x256xf32> to vector<1x8x256xf32>
    tpu.vector_store %arg7[%c0_84, %c0_85, %c0_86], %153 {strides = array<i32>} : memref<2x8x256xf32, #tpu.memory_space<vmem>>, vector<1x8x256xf32>,
    %154 = vector.extract_strided_slice %149 {offsets = [0, 256], sizes = [8, 256], strides = [1, 1]} : vector<8x512xf32> to vector<8x256xf32>
    %c1_87 = arith.constant 1 : index
    %c0_88 = arith.constant 0 : index
    %c0_89 = arith.constant 0 : index
    %155 = vector.load %arg7[%c1_87, %c0_88, %c0_89] : memref<2x8x256xf32, #tpu.memory_space<vmem>>, vector<1x8x256xf32>
    %156 = vector.shape_cast %155 : vector<1x8x256xf32> to vector<8x256xf32>
    %157 = vector.shape_cast %154 : vector<8x256xf32> to vector<1x8x256xf32>
    tpu.vector_store %arg7[%c1_87, %c0_88, %c0_89], %157 {strides = array<i32>} : memref<2x8x256xf32, #tpu.memory_space<vmem>>, vector<1x8x256xf32>,
    return
  }
  func.func @transform_0(%arg0: i32) -> (i32, i32, i32) {
    %c0_i32 = arith.constant 0 : i32
    %c0_i32_0 = arith.constant 0 : i32
    %c0_i32_1 = arith.constant 0 : i32
    return %arg0, %c0_i32, %c0_i32_0 : i32, i32, i32
  }
  func.func @transform_1(%arg0: i32) -> (i32, i32) {
    %c0_i32 = arith.constant 0 : i32
    %c0_i32_0 = arith.constant 0 : i32
    %c0_i32_1 = arith.constant 0 : i32
    return %c0_i32, %c0_i32_0 : i32, i32
  }
  func.func @transform_2(%arg0: i32) -> (i32, i32) {
    %c0_i32 = arith.constant 0 : i32
    %c0_i32_0 = arith.constant 0 : i32
    %c0_i32_1 = arith.constant 0 : i32
    return %c0_i32, %c0_i32_0 : i32, i32
  }
  func.func @transform_3(%arg0: i32) -> (i32, i32) {
    %c0_i32 = arith.constant 0 : i32
    %c0_i32_0 = arith.constant 0 : i32
    %c0_i32_1 = arith.constant 0 : i32
    return %c0_i32, %c0_i32_0 : i32, i32
  }
  func.func @transform_4(%arg0: i32) -> (i32, i32, i32) {
    %c0_i32 = arith.constant 0 : i32
    %c0_i32_0 = arith.constant 0 : i32
    %c0_i32_1 = arith.constant 0 : i32
    %c0_i32_2 = arith.constant 0 : i32
    return %c0_i32, %c0_i32_0, %c0_i32_1 : i32, i32, i32
  }
  func.func @transform_5(%arg0: i32) -> (i32, i32) {
    %c0_i32 = arith.constant 0 : i32
    %c0_i32_0 = arith.constant 0 : i32
    %c0_i32_1 = arith.constant 0 : i32
    return %c0_i32, %c0_i32_0 : i32, i32
  }
  func.func @transform_6(%arg0: i32) -> (i32, i32, i32) {
    %c0_i32 = arith.constant 0 : i32
    %c0_i32_0 = arith.constant 0 : i32
    %c0_i32_1 = arith.constant 0 : i32
    return %arg0, %c0_i32, %c0_i32_0 : i32, i32, i32
  }
}

</mosaic_0001>

<bundles_post_ra>
// kernel: wdsr_block_apply.1
= control target key start
LH: loop header
LB: loop body
LE: loop exit
PB: predicated region body
PF: predicated region fallthrough
CT: control target
= control target key end

     0   :  { %s1690_s25 = smov 111   ;;  %s1691_s30 = smov 112   ;;  %v2469_v4 = vmov 0   ;;  %v37_v9 = vlaneseq  ;;  %vm413_vm1 = vcmask 1043456   ;;  %vm516_vm9 = vcmask 588800   ;;  %s2462_s0 = inlined_call_operand.vmem [shape: f32[2,8,256], index: 0, kind: input, shape index: {}]   ;;  %s2463_s2 = inlined_call_operand.vmem [shape: bf16[32,72], index: 2, kind: input, shape index: {}]   ;;  %s2464_s3 = inlined_call_operand.vmem [shape: f32[32,1], index: 3, kind: input, shape index: {}]   ;;  %s2465_s1 = inlined_call_operand.vmem [shape: bf16[9,512], index: 1, kind: input, shape index: {}]   ;;  %s2466_s4 = inlined_call_operand.vmem [shape: bf16[9,8,32], index: 4, kind: input, shape index: {}]   ;;  %s2467_s5 = inlined_call_operand.vmem [shape: f32[8,1], index: 5, kind: input, shape index: {}]   ;;  %s2468_s6 = inlined_call_operand.vmem [shape: f32[2,8,256], index: 6, kind: output, shape index: {}]  }
   0x1   :  { %v1737_v0 = vld [vmem:[%s2462_s0 + $0x10] sm:$0xff]  ;;  %v1742_v1 = vld [vmem:[%s2462_s0] sm:$0xff]  ;;  %v1751_v2 = vld [vmem:[%s2462_s0 + $0x18] sm:$0xff]  ;;  %s1692_s7 = smov 113   ;;  %s1693_s8 = smov 127   ;;  %567 = vmatprep.mubr.bf16.mxu0 %v2469_v4  ;;  %620 = vmatprep.mubr.bf16.mxu1 %v2469_v4  ;;  %vm666_vm10 = vcmask 261120  }
   0x2   :  { %342 = vrot.lane.b32.xlu1 %v1737_v0, %s1690_s25  ;;  %338 = vrot.lane.b32.xlu0 %v1742_v1, %s1690_s25  ;;  %v1756_v3 = vld [vmem:[%s2462_s0 + $0x8] sm:$0xff]  ;;  %s1694_s9 = smov 1   ;;  %s1695_s10 = smov 15   ;;  %v485_v5 = vld [vmem:[%s2464_s3 + $0x18] sm:$0xff]  ;;  %v1834_v10 = vshrl.u32 %v37_v9, 7  ;;  %v1842_v13 = vand.u32 127, %v37_v9 }
   0x3   :  { %s1696_s11 = smov 16   ;;  %s1698_s12 = smov 17   ;;  %1683 = vset.pattern.permute.xlu1 %v2469_v4  ;;  %1682 = vset.pattern.permute.xlu0 %v2469_v4  ;;  %v484_v6 = vld [vmem:[%s2464_s3 + $0x10] sm:$0xff]  ;;  %v482_v7 = vld [vmem:[%s2464_s3] sm:$0xff]  ;;  %v483_v8 = vld [vmem:[%s2464_s3 + $0x8] sm:$0xff] }
   0x4   :  { %v352_v11 = vld [vmem:[%s2465_s1 + $0x18] sm:$0x11]  ;;  %v351_v12 = vld [vmem:[%s2465_s1 + $0x10] sm:$0x11]  ;;  %v1845_v14 = vsub.s32 0, %v1834_v10  ;;  %vm346_vm0 = vcmp.lt.s32.totalorder %v1842_v13, 111 }
   0x5   :  { %v355_v15 = vunpack.c.l.bf16 %v352_v11  ;;  %v353_v16 = vunpack.c.l.bf16 %v351_v12  ;;  %v354_v17 = vunpack.c.h.bf16 %v351_v12  ;;  %v356_v18 = vunpack.c.h.bf16 %v352_v11  ;;  %v1851_v21 = vld [vmem:[%s2465_s1] sm:$0x88]  ;;  %v272_v29 = vld [vmem:[%s2465_s1 + $0x8] sm:$0x88]  ;;  %v191_v50 = vld [vmem:[%s2465_s1] sm:$0x44] }
   0x6   :  { %344 = vrot.lane.b32.xlu1 %v1751_v2, %s1690_s25  ;;  %340 = vrot.lane.b32.xlu0 %v1756_v3, %s1690_s25  ;;  %v273_v28 = vunpack.c.l.bf16 %v1851_v21  ;;  %v316_v38 = vsub.s32 7, %v1834_v10  ;;  %v276_v39 = vunpack.c.h.bf16 %v272_v29  ;;  %v274_v40 = vunpack.c.h.bf16 %v1851_v21  ;;  %v1899_v54 = vld [vmem:[%s2465_s1 + $0x8] sm:$0x44] }
   0x7   :  { %v1854_v22 = vrot.slane %v355_v15, %v1845_v14  ;;  %v1857_v23 = vrot.slane %v353_v16, %v1845_v14  ;;  %v1860_v24 = vrot.slane %v354_v17, %v1845_v14  ;;  %v1863_v25 = vrot.slane %v356_v18, %v1845_v14 }
   0x8   :  { %v275_v41 = vunpack.c.l.bf16 %v272_v29  ;;  %vm309_vm2 = vcmp.lt.s32.totalorder %v1842_v13, 112  ;;  %v1891_v51 = vrot.slane %v276_v39, %v316_v38  ;;  %v1893_v52 = vrot.slane %v274_v40, %v316_v38 }
   0x9   :  { %2482 = vst [vmem:[#allocation2_spill] sm:$0xff] %v1854_v22  ;;  %2483 = vst [vmem:[#allocation3_spill] sm:$0xff] %v1857_v23  ;;  %v279_v53 = vsub.s32 6, %v1834_v10  ;;  %v199_v55 = vsub.s32 4, %v1834_v10  ;;  %v1902_v56 = vrot.slane %v273_v28, %v316_v38  ;;  %vm266_vm3 = vcmp.lt.s32.totalorder %v1842_v13, 113 }
   0xa   :  { %303 = vrot.lane.b32.xlu1 %v1756_v3, %s1691_s30  ;;  %301 = vrot.lane.b32.xlu0 %v1742_v1, %s1691_s30  ;;  %2484 = vst [vmem:[#allocation4_spill] sm:$0xff] %v1860_v24  ;;  %2485 = vst [vmem:[#allocation5_spill] sm:$0xff] %v1863_v25  ;;  %v1904_v58 = vrot.slane %v275_v41, %v316_v38  ;;  %v193_v63 = vunpack.c.l.bf16 %v191_v50  ;;  %vm229_vm4 = vcmp.lt.s32.totalorder %v1842_v13, 127  ;;  %vm162_vm5 = vcmp.lt.s32.totalorder %v1842_v13, 1 }
   0xb   :  { %2486 = vst [vmem:[#allocation6_spill] sm:$0xff] %v1891_v51  ;;  %2487 = vst [vmem:[#allocation7_spill] sm:$0xff] %v1893_v52  ;;  %v1919_v12 = vrot.slane %v273_v28, %v279_v53  ;;  %v1937_v28 = vld [vmem:[%s2465_s1] sm:$0x22]  ;;  %vm119_vm6 = vcmp.lt.s32.totalorder %v1842_v13, 15  ;;  %vm82_vm7 = vcmp.lt.s32.totalorder %v1842_v13, 16 }
   0xc   :  { %2488 = vst [vmem:[#allocation8_spill] sm:$0xff] %v1902_v56  ;;  %2489 = vst [vmem:[#allocation9_spill] sm:$0xff] %v1904_v58  ;;  %v1921_v15 = vrot.slane %v193_v63, %v199_v55  ;;  %vm39_vm8 = vcmp.lt.s32.totalorder %v1842_v13, 17 }
   0xe   :  { %307 = vrot.lane.b32.xlu1 %v1751_v2, %s1691_s30  ;;  %305 = vrot.lane.b32.xlu0 %v1737_v0, %s1691_s30 }
  0x11   :  { %v2504_v13 = vld [vmem:[#allocation5_spill] sm:$0xff] }
  0x12   :  { %260 = vrot.lane.b32.xlu1 %v1756_v3, %s1692_s7  ;;  %258 = vrot.lane.b32.xlu0 %v1742_v1, %s1692_s7 }
  0x16   :  { %264 = vrot.lane.b32.xlu1 %v1751_v2, %s1692_s7  ;;  %262 = vrot.lane.b32.xlu0 %v1737_v0, %s1692_s7 }
  0x1a   :  { %223 = vrot.lane.b32.xlu1 %v1756_v3, %s1693_s8  ;;  %221 = vrot.lane.b32.xlu0 %v1742_v1, %s1693_s8 }
  0x1e   :  { %227 = vrot.lane.b32.xlu1 %v1751_v2, %s1693_s8  ;;  %225 = vrot.lane.b32.xlu0 %v1737_v0, %s1693_s8 }
  0x22   :  { %156 = vrot.lane.b32.xlu1 %v1756_v3, %s1694_s9  ;;  %154 = vrot.lane.b32.xlu0 %v1742_v1, %s1694_s9 }
  0x26   :  { %160 = vrot.lane.b32.xlu1 %v1751_v2, %s1694_s9  ;;  %158 = vrot.lane.b32.xlu0 %v1737_v0, %s1694_s9 }
  0x2a   :  { %113 = vrot.lane.b32.xlu1 %v1756_v3, %s1695_s10  ;;  %111 = vrot.lane.b32.xlu0 %v1742_v1, %s1695_s10 }
  0x2e   :  { %117 = vrot.lane.b32.xlu1 %v1751_v2, %s1695_s10  ;;  %115 = vrot.lane.b32.xlu0 %v1737_v0, %s1695_s10 }
  0x32   :  { %76 = vrot.lane.b32.xlu1 %v1756_v3, %s1696_s11  ;;  %74 = vrot.lane.b32.xlu0 %v1742_v1, %s1696_s11 }
  0x36   :  { %80 = vrot.lane.b32.xlu1 %v1751_v2, %s1696_s11  ;;  %78 = vrot.lane.b32.xlu0 %v1737_v0, %s1696_s11 }
  0x3a   :  { %31 = vrot.lane.b32.xlu1 %v1756_v3, %s1698_s12  ;;  %29 = vrot.lane.b32.xlu0 %v1742_v1, %s1698_s12 }
  0x3e   :  { %35 = vrot.lane.b32.xlu1 %v1751_v2, %s1698_s12  ;;  %33 = vrot.lane.b32.xlu0 %v1737_v0, %s1698_s12 }
  0x42   :  { %503 = vperm.xlu1 %1683, %v485_v5   ;;  %498 = vperm.xlu0 %1682, %v484_v6   ;;  %v236_v6 = vsub.s32 5, %v1834_v10 }
  0x44   :  { %v1939_v29 = vrot.slane %v193_v63, %v236_v6 }
  0x46   :  { %488 = vperm.xlu1 %1683, %v482_v7   ;;  %493 = vperm.xlu0 %1682, %v483_v8   ;;  %v196_v7 = vunpack.c.h.bf16 %v1899_v54  ;;  %v194_v8 = vunpack.c.h.bf16 %v191_v50 }
  0x74   :  { %v343_v19 = vpop.permute.xlu1 %342  ;;  %v339_v20 = vpop.permute.xlu0 %338 }
  0x78   :  { %v345_v26 = vpop.permute.xlu1 %344  ;;  %v341_v27 = vpop.permute.xlu0 %340 }
  0x79   :  { %v347_v30 = vsel %vm346_vm0, %v343_v19, %v345_v26  ;;  %v350_v31 = vsel %vm346_vm0, %v345_v26, %v339_v20  ;;  %v348_v32 = vsel %vm346_vm0, %v341_v27, %v343_v19  ;;  %v349_v33 = vsel %vm346_vm0, %v339_v20, %v341_v27 }
  0x7a   :  { %v375_v34 = vmul.f32 %v1854_v22, %v347_v30  ;;  %v373_v35 = vmul.f32 %v1857_v23, %v349_v33  ;;  %v374_v36 = vmul.f32 %v1860_v24, %v348_v32  ;;  %v376_v37 = vmul.f32 %v1863_v25, %v350_v31 }
  0x7b   :  { %v1924_v19 = vrot.slane %v276_v39, %v279_v53  ;;  %v1926_v20 = vrot.slane %v274_v40, %v279_v53  ;;  %v1931_v27 = vrot.slane %v275_v41, %v279_v53  ;;  %v1941_v30 = vrot.slane %v196_v7, %v236_v6 }
  0x7c   :  { %v304_v42 = vpop.permute.xlu1 %303  ;;  %v302_v43 = vpop.permute.xlu0 %301  ;;  %v378_v44 = vpack.c.bf16 %v374_v36, %v374_v36  ;;  %v380_v45 = vpack.c.bf16 %v376_v37, %v376_v37  ;;  %v377_v46 = vpack.c.bf16 %v373_v35, %v373_v35  ;;  %v379_v47 = vpack.c.bf16 %v375_v34, %v375_v34 }
  0x7d   :  { %v312_v5 = vsel %vm309_vm2, %v302_v43, %v304_v42  ;;  %2490 = vst [vmem:[#allocation10_spill] sm:$0xff] %v1924_v19  ;;  %2491 = vst [vmem:[#allocation11_spill] sm:$0xff] %v1926_v20  ;;  %v195_v31 = vunpack.c.l.bf16 %v1899_v54  ;;  %v1944_v32 = vrot.slane %v194_v8, %v236_v6  ;;  %v1949_v36 = vmul.f32 %v1921_v15, %v1742_v1 }
  0x7e   :  { %1639 = vmatprep.subr.msk.bf16.mxu0 %vm413_vm1, %v378_v44  ;;  %1642 = vmatprep.subr.msk.bf16.mxu1 %vm413_vm1, %v380_v45  ;;  %v524_v48 = vsel %vm413_vm1, %v377_v46, 0  ;;  %v530_v49 = vsel %vm413_vm1, %v379_v47, 0  ;;  %v330_v21 = vmul.f32 %v1902_v56, %v312_v5  ;;  %2492 = vst [vmem:[#allocation12_spill] sm:$0xff] %v1931_v27  ;;  %v127_v40 = vunpack.c.h.bf16 %v1937_v28 }
  0x7f   :  { %542 = vmatpush1.bf16.msra.mxu0 %v524_v48  ;;  %595 = vmatpush1.bf16.msra.mxu1 %v530_v49  ;;  %v1953_v41 = vsub.s32 3, %v1834_v10  ;;  %v1966_v49 = vrot.slane %v196_v7, %v199_v55  ;;  %v217_v7 = vpack.c.bf16 %v1949_v36, %v1949_v36 }
  0x80   :  { %v308_v57 = vpop.permute.xlu1 %307  ;;  %v306_v59 = vpop.permute.xlu0 %305 }
  0x81   :  { %v313_v60 = vsel %vm309_vm2, %v308_v57, %v302_v43  ;;  %v310_v61 = vsel %vm309_vm2, %v306_v59, %v308_v57  ;;  %v311_v62 = vsel %vm309_vm2, %v304_v42, %v306_v59  ;;  %v1955_v42 = vrot.slane %v194_v8, %v199_v55 }
  0x82   :  { %v333_v9 = vmul.f32 %v1891_v51, %v313_v60  ;;  %v331_v11 = vmul.f32 %v1893_v52, %v311_v62  ;;  %v332_v16 = vmul.f32 %v1904_v58, %v310_v61  ;;  %v334_v43 = vpack.c.bf16 %v330_v21, %v330_v21 }
  0x83   :  { %v1968_v57 = vrot.slane %v195_v31, %v199_v55  ;;  %v1994_v36 = vrot.slane %v127_v40, %v1953_v41 }
  0x84   :  { %v261_v17 = vpop.permute.xlu1 %260  ;;  %v259_v18 = vpop.permute.xlu0 %258  ;;  %v337_v33 = vpack.c.bf16 %v333_v9, %v333_v9  ;;  %v335_v34 = vpack.c.bf16 %v331_v11, %v331_v11  ;;  %v336_v37 = vpack.c.bf16 %v332_v16, %v332_v16  ;;  %v409_v8 = vrot.slane %v334_v43, 4 }
  0x85   :  { %v269_v26 = vsel %vm266_vm3, %v259_v18, %v261_v17  ;;  %v1972_v11 = vrot.slane %v195_v31, %v236_v6  ;;  %v1984_v6 = vld [vmem:[%s2465_s1 + $0x8] sm:$0x22]  ;;  %v216_v31 = vmul.f32 %v1751_v2, %v1966_v49 }
  0x86   :  { %v293_v35 = vmul.f32 %v1919_v12, %v269_v26  ;;  %v412_v50 = vrot.slane %v337_v33, 4  ;;  %v410_v53 = vrot.slane %v335_v34, 4  ;;  %v411_v59 = vrot.slane %v336_v37, 4 }
  0x87   :  { %v214_v26 = vmul.f32 %v1955_v42, %v1756_v3  ;;  %v215_v37 = vmul.f32 %v1737_v0, %v1968_v57 }
  0x88   :  { %v265_v38 = vpop.permute.xlu1 %264  ;;  %v263_v39 = vpop.permute.xlu0 %262  ;;  %v297_v54 = vpack.c.bf16 %v293_v35, %v293_v35 }
  0x89   :  { %v270_v44 = vsel %vm266_vm3, %v265_v38, %v259_v18  ;;  %v267_v45 = vsel %vm266_vm3, %v263_v39, %v265_v38  ;;  %v268_v1 = vsel %vm266_vm3, %v261_v17, %v263_v39  ;;  %v126_v39 = vunpack.c.l.bf16 %v1937_v28 }
  0x8a   :  { %v296_v46 = vmul.f32 %v1924_v19, %v270_v44  ;;  %v294_v47 = vmul.f32 %v1926_v20, %v268_v1  ;;  %v295_v48 = vmul.f32 %v1931_v27, %v267_v45  ;;  %v464_v21 = vsel %vm413_vm1, %v297_v54, %v409_v8 }
  0x8b   :  { %v128_v1 = vunpack.c.l.bf16 %v1984_v6 }
  0x8c   :  { %v300_v60 = vpack.c.bf16 %v296_v46, %v296_v46  ;;  %v298_v61 = vpack.c.bf16 %v294_v47, %v294_v47  ;;  %v299_v62 = vpack.c.bf16 %v295_v48, %v295_v48  ;;  %v224_v63 = vpop.permute.xlu1 %223  ;;  %v222_v5 = vpop.permute.xlu0 %221  ;;  %v129_v46 = vunpack.c.h.bf16 %v1984_v6 }
  0x8d   :  { %v232_v9 = vsel %vm229_vm4, %v222_v5, %v224_v63  ;;  %v218_v47 = vpack.c.bf16 %v214_v26, %v214_v26  ;;  %v220_v48 = vpack.c.bf16 %v216_v31, %v216_v31 }
  0x8e   :  { %v250_v16 = vmul.f32 %v1939_v29, %v232_v9  ;;  %v468_v55 = vsel %vm413_vm1, %v298_v61, %v410_v53  ;;  %v476_v17 = vsel %vm413_vm1, %v300_v60, %v412_v50  ;;  %v472_v18 = vsel %vm413_vm1, %v299_v62, %v411_v59 }
  0x8f   :  { %543 = vmatprep.subr.bf16.mxu0 %v468_v55  ;;  %596 = vmatprep.subr.bf16.mxu1 %v476_v17  ;;  %v219_v61 = vpack.c.bf16 %v215_v37, %v215_v37  ;;  %v132_v9 = vsub.s32 2, %v1834_v10  ;;  %v2017_v55 = vrot.slane %v128_v1, %v1953_v41  ;;  %v2020_v17 = vrot.slane %v129_v46, %v1953_v41 }
  0x90   :  { %v254_v33 = vpack.c.bf16 %v250_v16, %v250_v16  ;;  %v228_v34 = vpop.permute.xlu1 %227  ;;  %544 = vmatpush1.bf16.msra.mxu0 %v464_v21  ;;  %597 = vmatpush1.bf16.msra.mxu1 %v472_v18  ;;  %v226_v35 = vpop.permute.xlu0 %225  ;;  %v2014_v16 = vrot.slane %v126_v39, %v1953_v41 }
  0x91   :  { %v233_v3 = vsel %vm229_vm4, %v228_v34, %v222_v5  ;;  %v230_v2 = vsel %vm229_vm4, %v226_v35, %v228_v34  ;;  %v231_v38 = vsel %vm229_vm4, %v224_v63, %v226_v35 }
  0x92   :  { %v253_v43 = vmul.f32 %v1941_v30, %v233_v3  ;;  %v251_v44 = vmul.f32 %v1944_v32, %v231_v38  ;;  %v252_v45 = vmul.f32 %v1972_v11, %v230_v2  ;;  %v401_v0 = vrot.slane %v254_v33, 4 }
  0x93   :  { %v2041_v3 = vrot.slane %v127_v40, %v132_v9  ;;  %v2051_v40 = vrot.slane %v126_v39, %v132_v9  ;;  %v45_v39 = vld [vmem:[%s2465_s1 + $0x8] sm:$0x11] }
  0x94   :  { %v257_v50 = vpack.c.bf16 %v253_v43, %v253_v43  ;;  %v255_v53 = vpack.c.bf16 %v251_v44, %v251_v44  ;;  %v256_v54 = vpack.c.bf16 %v252_v45, %v252_v45  ;;  %v157_v59 = vpop.permute.xlu1 %156  ;;  %v155_v60 = vpop.permute.xlu0 %154  ;;  %v448_v18 = vsel %vm413_vm1, %v217_v7, %v401_v0  ;;  %v2036_v7 = vld [vmem:[%s2465_s1] sm:$0x11] }
  0x95   :  { %v165_v62 = vsel %vm162_vm5, %v155_v60, %v157_v59 }
  0x96   :  { %v404_v63 = vrot.slane %v257_v50, 4  ;;  %v402_v5 = vrot.slane %v255_v53, 4  ;;  %v403_v8 = vrot.slane %v256_v54, 4  ;;  %v184_v21 = vmul.f32 %v1994_v36, %v165_v62 }
  0x97   :  { %v2053_v53 = vrot.slane %v128_v1, %v132_v9  ;;  %v2055_v54 = vrot.slane %v129_v46, %v132_v9 }
  0x98   :  { %v161_v6 = vpop.permute.xlu1 %160  ;;  %v159_v26 = vpop.permute.xlu0 %158  ;;  %v452_v31 = vsel %vm413_vm1, %v218_v47, %v402_v5  ;;  %v460_v33 = vsel %vm413_vm1, %v220_v48, %v404_v63  ;;  %v456_v34 = vsel %vm413_vm1, %v219_v61, %v403_v8  ;;  %v188_v43 = vpack.c.bf16 %v184_v21, %v184_v21 }
  0x99   :  { %v166_v35 = vsel %vm162_vm5, %v161_v6, %v155_v60  ;;  %v163_v37 = vsel %vm162_vm5, %v159_v26, %v161_v6  ;;  %v164_v41 = vsel %vm162_vm5, %v157_v59, %v159_v26  ;;  %545 = vmatprep.subr.bf16.mxu0 %v452_v31  ;;  %598 = vmatprep.subr.bf16.mxu1 %v460_v33  ;;  %v47_v47 = vunpack.c.h.bf16 %v2036_v7 }
  0x9a   :  { %546 = vmatpush1.bf16.msra.mxu0 %v448_v18  ;;  %599 = vmatpush1.bf16.msra.mxu1 %v456_v34  ;;  %v183_v2 = vmul.f32 %v2014_v16, %v166_v35  ;;  %v185_v38 = vmul.f32 %v2017_v55, %v164_v41  ;;  %v186_v44 = vmul.f32 %v2020_v17, %v163_v37  ;;  %v89_v48 = vsub.s32 1, %v1834_v10 }
  0x9b   :  { %v394_v61 = vrot.slane %v188_v43, 4  ;;  %v46_v18 = vunpack.c.l.bf16 %v2036_v7  ;;  %v48_v35 = vunpack.c.l.bf16 %v45_v39  ;;  %v49_v37 = vunpack.c.h.bf16 %v45_v39 }
  0x9c   :  { %v114_v45 = vpop.permute.xlu1 %113  ;;  %v112_v0 = vpop.permute.xlu0 %111  ;;  %v187_v59 = vpack.c.bf16 %v183_v2, %v183_v2  ;;  %v189_v60 = vpack.c.bf16 %v185_v38, %v185_v38  ;;  %v190_v62 = vpack.c.bf16 %v186_v44, %v186_v44  ;;  %v2058_v8 = vrot.slane %v47_v47, %v89_v48 }
  0x9d   :  { %v122_v50 = vsel %vm119_vm6, %v112_v0, %v114_v45 }
  0x9e   :  { %v147_v28 = vmul.f32 %v2041_v3, %v122_v50  ;;  %v393_v33 = vrot.slane %v187_v59, 4  ;;  %v395_v34 = vrot.slane %v189_v60, 4  ;;  %v396_v41 = vrot.slane %v190_v62, 4 }
  0x9f   :  { %v2079_v59 = vrot.slane %v46_v18, %v89_v48  ;;  %v2081_v60 = vrot.slane %v48_v35, %v89_v48 }
  0xa0   :  { %v151_v63 = vpack.c.bf16 %v147_v28, %v147_v28  ;;  %v118_v5 = vpop.permute.xlu1 %117  ;;  %v116_v10 = vpop.permute.xlu0 %115 }
  0xa1   :  { %v123_v1 = vsel %vm119_vm6, %v118_v5, %v112_v0  ;;  %v120_v46 = vsel %vm119_vm6, %v116_v10, %v118_v5  ;;  %v121_v9 = vsel %vm119_vm6, %v114_v45, %v116_v10 }
  0xa2   :  { %v146_v21 = vmul.f32 %v2051_v40, %v123_v1  ;;  %v148_v6 = vmul.f32 %v2053_v53, %v121_v9  ;;  %v149_v26 = vmul.f32 %v2055_v54, %v120_v46  ;;  %v436_v31 = vsel %vm413_vm1, %v151_v63, %v394_v61 }
  0xa3   :  { %547 = vmatprep.subr.bf16.mxu0 %v436_v31  ;;  %v2084_v63 = vrot.slane %v49_v37, %v89_v48  ;;  %v2094_v46 = vrot.slane %v47_v47, %v1845_v14  ;;  %v2106_v47 = vrot.slane %v48_v35, %v1845_v14 }
  0xa4   :  { %v150_v2 = vpack.c.bf16 %v146_v21, %v146_v21  ;;  %v152_v38 = vpack.c.bf16 %v148_v6, %v148_v6  ;;  %v153_v43 = vpack.c.bf16 %v149_v26, %v149_v26  ;;  %v77_v44 = vpop.permute.xlu1 %76  ;;  %v75_v45 = vpop.permute.xlu0 %74 }
  0xa5   :  { %v85_v7 = vsel %vm82_vm7, %v75_v45, %v77_v44 }
  0xa6   :  { %v432_v0 = vsel %vm413_vm1, %v150_v2, %v393_v33  ;;  %v444_v50 = vsel %vm413_vm1, %v153_v43, %v396_v41  ;;  %v440_v28 = vsel %vm413_vm1, %v152_v38, %v395_v34  ;;  %v104_v61 = vmul.f32 %v2058_v8, %v85_v7 }
  0xa7   :  { %548 = vmatpush1.bf16.msra.mxu0 %v432_v0  ;;  %600 = vmatprep.subr.bf16.mxu1 %v444_v50  ;;  %v2103_v41 = vrot.slane %v46_v18, %v1845_v14  ;;  %v2109_v2 = vrot.slane %v49_v37, %v1845_v14 }
  0xa8   :  { %v81_v62 = vpop.permute.xlu1 %80  ;;  %601 = vmatpush1.bf16.msra.mxu1 %v440_v28  ;;  %v79_v5 = vpop.permute.xlu0 %78  ;;  %v108_v21 = vpack.c.bf16 %v104_v61, %v104_v61 }
  0xa9   :  { %v86_v10 = vsel %vm82_vm7, %v81_v62, %v75_v45  ;;  %v83_v39 = vsel %vm82_vm7, %v79_v5, %v81_v62  ;;  %v84_v1 = vsel %vm82_vm7, %v77_v44, %v79_v5 }
  0xaa   :  { %v103_v9 = vmul.f32 %v2079_v59, %v86_v10  ;;  %v105_v48 = vmul.f32 %v2081_v60, %v84_v1  ;;  %v106_v6 = vmul.f32 %v2084_v63, %v83_v39  ;;  %v386_v44 = vrot.slane %v108_v21, 4 }
  0xac   :  { %v32_v26 = vpop.permute.xlu1 %31  ;;  %v30_v31 = vpop.permute.xlu0 %29  ;;  %v107_v38 = vpack.c.bf16 %v103_v9, %v103_v9  ;;  %v109_v43 = vpack.c.bf16 %v105_v48, %v105_v48  ;;  %v110_v45 = vpack.c.bf16 %v106_v6, %v106_v6 }
  0xad   :  { %v42_v33 = vsel %vm39_vm8, %v30_v31, %v32_v26 }
  0xae   :  { %v67_v34 = vmul.f32 %v2094_v46, %v42_v33  ;;  %v385_v5 = vrot.slane %v107_v38, 4  ;;  %v387_v10 = vrot.slane %v109_v43, 4  ;;  %v388_v39 = vrot.slane %v110_v45, 4  ;;  %v1685_v33 = vld [vmem:[%s2463_s2 + $0x8] sm:$0xff]  }
  0xb0   :  { %v71_v7 = vpack.c.bf16 %v67_v34, %v67_v34  ;;  %v36_v0 = vpop.permute.xlu1 %35  ;;  %v34_v50 = vpop.permute.xlu0 %33 }
  0xb1   :  { %v43_v28 = vsel %vm39_vm8, %v36_v0, %v30_v31  ;;  %v40_v18 = vsel %vm39_vm8, %v34_v50, %v36_v0  ;;  %v41_v35 = vsel %vm39_vm8, %v32_v26, %v34_v50  ;;  %v1684_v31 = vld [vmem:[%s2463_s2] sm:$0xff]  }
  0xb2   :  { %v66_v61 = vmul.f32 %v2103_v41, %v43_v28  ;;  %v68_v14 = vmul.f32 %v2106_v47, %v41_v35  ;;  %v69_v37 = vmul.f32 %v2109_v2, %v40_v18  ;;  %v420_v62 = vsel %vm413_vm1, %v71_v7, %v386_v44 }
  0xb3   :  { %549 = vmatprep.subr.bf16.mxu0 %v420_v62 }
  0xb4   :  { %v70_v1 = vpack.c.bf16 %v66_v61, %v66_v61  ;;  %v72_v9 = vpack.c.bf16 %v68_v14, %v68_v14  ;;  %v73_v48 = vpack.c.bf16 %v69_v37, %v69_v37 }
  0xb6   :  { %v416_v21 = vsel %vm413_vm1, %v70_v1, %v385_v5  ;;  %v428_v6 = vsel %vm413_vm1, %v73_v48, %v388_v39  ;;  %v424_v26 = vsel %vm413_vm1, %v72_v9, %v387_v10 }
  0xb7   :  { %550 = vmatpush1.bf16.msra.mxu0 %v416_v21  ;;  %602 = vmatprep.subr.bf16.mxu1 %v428_v6 }
  0xb8   :  { %603 = vmatpush1.bf16.msra.mxu1 %v424_v26 }
  0xba   :  { %1640 = vmatmul.mubr.msk.bf16.vlgmr.msra.gmra.mxu0 %vm516_vm9, %v1684_v31 }
  0xbb   :  { %1643 = vmatmul.mubr.msk.bf16.vlgmr.msra.gmra.mxu1 %vm516_vm9, %v1684_v31  ;;  %577 = vmatprep.mubr.bf16.mxu0 %v2469_v4 }
  0xbc   :  { %630 = vmatprep.mubr.bf16.mxu1 %v2469_v4 }
  0xbd   :  { %v504_v44 = vpop.permute.xlu1 %503  ;;  %v499_v0 = vpop.permute.xlu0 %498 }
  0xc1   :  { %v489_v61 = vpop.permute.xlu1 %488  ;;  %v494_v62 = vpop.permute.xlu0 %493 }
  0xc2   :  { %1641 = vmatmul.mubr.msk.bf16.gmra.mxu0 %vm516_vm9, %v1685_v33 }
  0xc3   :  { %1644 = vmatmul.mubr.msk.bf16.gmra.mxu1 %vm516_vm9, %v1685_v33  ;;  %702 = vmatprep.mubr.bf16.mxu0 %v2469_v4 }
  0xc4   :  { %743 = vmatprep.mubr.bf16.mxu1 %v2469_v4 }
 0x17a   :  { %v569_v34 = vpop.f32.mrf.mxu0 }
 0x17b   :  { %v622_v38 = vpop.f32.mrf.mxu1  ;;  %v570_v10 = vadd.f32 %v569_v34, %v489_v61 }
 0x17c   :  { %v571_v43 = vpop.f32.mrf.mxu0  ;;  %v623_v9 = vadd.f32 %v622_v38, %v489_v61 }
 0x17d   :  { %v624_v45 = vpop.f32.mrf.mxu1  ;;  %v572_v24 = vadd.f32 %v571_v43, %v489_v61 }
 0x17e   :  { %v573_v7 = vpop.f32.mrf.mxu0  ;;  %v625_v23 = vadd.f32 %v624_v45, %v489_v61 }
 0x17f   :  { %v626_v50 = vpop.f32.mrf.mxu1  ;;  %v574_v51 = vadd.f32 %v573_v7, %v494_v62 }
 0x180   :  { %v575_v28 = vpop.f32.mrf.mxu0  ;;  %v627_v56 = vadd.f32 %v626_v50, %v494_v62  ;;  %v644_v43 = vmax.f32 %v625_v23, 0.0  ;;  %v643_v50 = vmax.f32 %v623_v9, 0.0  ;;  %v1668_v9 = vld [vmem:[%s2466_s4 + $0x20] sm:$0xf] }
 0x181   :  { %v628_v18 = vpop.f32.mrf.mxu1  ;;  %v576_v39 = vadd.f32 %v575_v28, %v494_v62  ;;  %v645_v45 = vmax.f32 %v574_v51, 0.0  ;;  %v665_v51 = vld [vmem:[%s2466_s4] sm:$0xf] }
 0x182   :  { %v579_v35 = vpop.f32.mrf.mxu0  ;;  %v629_v31 = vadd.f32 %v628_v18, %v494_v62  ;;  %v647_v61 = vmax.f32 %v627_v56, 0.0  ;;  %v2493_v56 = vmov 0   ;;  %v1659_v62 = vld [vmem:[%s2466_s4 + $0x14] sm:$0xf] }
 0x183   :  { %v632_v14 = vpop.f32.mrf.mxu1  ;;  %v580_v33 = vadd.f32 %v579_v35, %v499_v0  ;;  %v646_v19 = vmax.f32 %v576_v39, 0.0  ;;  %v1665_v39 = vld [vmem:[%s2466_s4 + $0x1c] sm:$0xf] }
 0x184   :  { %v581_v37 = vpop.f32.mrf.mxu0  ;;  %v633_v48 = vadd.f32 %v632_v14, %v499_v0 }
 0x185   :  { %v634_v5 = vpop.f32.mrf.mxu1  ;;  %v582_v21 = vadd.f32 %v581_v37, %v499_v0  ;;  %v649_v20 = vmax.f32 %v580_v33, 0.0 }
 0x186   :  { %v583_v1 = vpop.f32.mrf.mxu0  ;;  %v635_v4 = vadd.f32 %v634_v5, %v499_v0  ;;  %v651_v27 = vmax.f32 %v633_v48, 0.0  ;;  %v642_v0 = vmax.f32 %v572_v24, 0.0  ;;  %v2154_v24 = vpack.c.bf16 %v647_v61, %v643_v50 }
 0x187   :  { %v584_v6 = vadd.f32 %v583_v1, %v504_v44  ;;  %v636_v26 = vpop.f32.mrf.mxu1  ;;  %v650_v38 = vmax.f32 %v582_v21, 0.0  ;;  %v648_v1 = vmax.f32 %v629_v31, 0.0 }
 0x188   :  { %v637_v25 = vadd.f32 %v636_v26, %v504_v44  ;;  %v585_v22 = vpop.f32.mrf.mxu0  ;;  %v652_v18 = vmax.f32 %v635_v4, 0.0 }
 0x189   :  { %v586_v58 = vadd.f32 %v585_v22, %v504_v44  ;;  %v638_v52 = vpop.f32.mrf.mxu1  ;;  %v653_v34 = vmax.f32 %v584_v6, 0.0  ;;  %v2145_v4 = vpack.c.bf16 %v648_v1, %v644_v43 }
 0x18a   :  { %v639_v28 = vadd.f32 %v638_v52, %v504_v44  ;;  %v655_v14 = vmax.f32 %v637_v25, 0.0  ;;  %v2140_v52 = vpack.c.bf16 %v646_v19, %v642_v0  ;;  %v641_v25 = vmax.f32 %v570_v10, 0.0  ;;  %v1650_v19 = vld [vmem:[%s2466_s4 + $0x8] sm:$0xf]  ;;  %v1662_v10 = vld [vmem:[%s2466_s4 + $0x18] sm:$0xf] }
 0x18b   :  { %v654_v37 = vmax.f32 %v586_v58, 0.0  ;;  %v2136_v7 = vpack.c.bf16 %v653_v34, %v649_v20  ;;  %v1647_v58 = vld [vmem:[%s2466_s4 + $0x4] sm:$0xf]  ;;  %v1653_v20 = vld [vmem:[%s2466_s4 + $0xc] sm:$0xf] }
 0x18c   :  { %v656_v35 = vmax.f32 %v639_v28, 0.0  ;;  %v2142_v44 = vpack.c.bf16 %v655_v14, %v651_v27  ;;  %v2151_v23 = vpack.c.bf16 %v645_v45, %v641_v25  ;;  %v1656_v27 = vld [vmem:[%s2466_s4 + $0x10] sm:$0xf] }
 0x18d   :  { %v2134_v5 = vpack.c.bf16 %v654_v37, %v650_v38 }
 0x18e   :  { %v2138_v22 = vpack.c.bf16 %v656_v35, %v652_v18 }
 0x18f   :  { %682 = vmatprep.subr.bf16.mxu0 %v2134_v5 }
 0x190   :  { %683 = vmatpush1.bf16.msra.mxu0 %v2136_v7  ;;  %723 = vmatprep.subr.bf16.mxu1 %v2138_v22 }
 0x191   :  { %684 = vmatprep.subr.bf16.mxu0 %v2140_v52  ;;  %724 = vmatpush1.bf16.msra.mxu1 %v2142_v44 }
 0x192   :  { %725 = vmatprep.subr.bf16.mxu1 %v2145_v4 }
 0x194   :  { %685 = vmatpush1.bf16.msra.mxu0 %v2151_v23 }
 0x195   :  { %726 = vmatpush1.bf16.msra.mxu1 %v2154_v24  ;;  %785 = vmatprep.subr.bf16.mxu0 %v2134_v5 }
 0x196   :  { %826 = vmatprep.subr.bf16.mxu1 %v2138_v22 }
 0x197   :  { %1645 = vmatmul.mubr.msk.bf16.vlgmr.msra.gmra.mxu0 %vm666_vm10, %v665_v51 }
 0x198   :  { %786 = vmatpush1.bf16.msra.mxu0 %v2136_v7  ;;  %1646 = vmatmul.mubr.msk.bf16.vlgmr.msra.gmra.mxu1 %vm666_vm10, %v665_v51 }
 0x199   :  { %787 = vmatprep.subr.bf16.mxu0 %v2140_v52  ;;  %827 = vmatpush1.bf16.msra.mxu1 %v2142_v44 }
 0x19a   :  { %828 = vmatprep.subr.bf16.mxu1 %v2145_v4  ;;  %805 = vmatprep.mubr.bf16.mxu0 %v2493_v56 }
 0x19b   :  { %846 = vmatprep.mubr.bf16.mxu1 %v2493_v56 }
 0x19c   :  { %788 = vmatpush1.bf16.msra.mxu0 %v2151_v23 }
 0x19d   :  { %829 = vmatpush1.bf16.msra.mxu1 %v2154_v24  ;;  %892 = vmatprep.subr.bf16.mxu0 %v2134_v5 }
 0x19e   :  { %933 = vmatprep.subr.bf16.mxu1 %v2138_v22 }
 0x19f   :  { %1648 = vmatmul.mubr.msk.bf16.vlgmr.msra.gmra.mxu0 %vm666_vm10, %v1647_v58 }
 0x1a0   :  { %893 = vmatpush1.bf16.msra.mxu0 %v2136_v7  ;;  %1649 = vmatmul.mubr.msk.bf16.vlgmr.msra.gmra.mxu1 %vm666_vm10, %v1647_v58 }
 0x1a1   :  { %894 = vmatprep.subr.bf16.mxu0 %v2140_v52  ;;  %934 = vmatpush1.bf16.msra.mxu1 %v2142_v44 }
 0x1a2   :  { %935 = vmatprep.subr.bf16.mxu1 %v2145_v4  ;;  %912 = vmatprep.mubr.bf16.mxu0 %v2493_v56 }
 0x1a3   :  { %953 = vmatprep.mubr.bf16.mxu1 %v2493_v56 }
 0x1a4   :  { %895 = vmatpush1.bf16.msra.mxu0 %v2151_v23 }
 0x1a5   :  { %936 = vmatpush1.bf16.msra.mxu1 %v2154_v24  ;;  %999 = vmatprep.subr.bf16.mxu0 %v2134_v5 }
 0x1a6   :  { %1040 = vmatprep.subr.bf16.mxu1 %v2138_v22 }
 0x1a7   :  { %1651 = vmatmul.mubr.msk.bf16.vlgmr.msra.gmra.mxu0 %vm666_vm10, %v1650_v19 }
 0x1a8   :  { %1000 = vmatpush1.bf16.msra.mxu0 %v2136_v7  ;;  %1652 = vmatmul.mubr.msk.bf16.vlgmr.msra.gmra.mxu1 %vm666_vm10, %v1650_v19 }
 0x1a9   :  { %1001 = vmatprep.subr.bf16.mxu0 %v2140_v52  ;;  %1041 = vmatpush1.bf16.msra.mxu1 %v2142_v44 }
 0x1aa   :  { %1042 = vmatprep.subr.bf16.mxu1 %v2145_v4  ;;  %1019 = vmatprep.mubr.bf16.mxu0 %v2493_v56 }
 0x1ab   :  { %1060 = vmatprep.mubr.bf16.mxu1 %v2493_v56 }
 0x1ac   :  { %1002 = vmatpush1.bf16.msra.mxu0 %v2151_v23 }
 0x1ad   :  { %1043 = vmatpush1.bf16.msra.mxu1 %v2154_v24  ;;  %1106 = vmatprep.subr.bf16.mxu0 %v2134_v5 }
 0x1ae   :  { %1147 = vmatprep.subr.bf16.mxu1 %v2138_v22 }
 0x1af   :  { %1654 = vmatmul.mubr.msk.bf16.vlgmr.msra.gmra.mxu0 %vm666_vm10, %v1653_v20 }
 0x1b0   :  { %1107 = vmatpush1.bf16.msra.mxu0 %v2136_v7  ;;  %1655 = vmatmul.mubr.msk.bf16.vlgmr.msra.gmra.mxu1 %vm666_vm10, %v1653_v20 }
 0x1b1   :  { %1108 = vmatprep.subr.bf16.mxu0 %v2140_v52  ;;  %1148 = vmatpush1.bf16.msra.mxu1 %v2142_v44 }
 0x1b2   :  { %1149 = vmatprep.subr.bf16.mxu1 %v2145_v4  ;;  %1126 = vmatprep.mubr.bf16.mxu0 %v2493_v56 }
 0x1b3   :  { %1167 = vmatprep.mubr.bf16.mxu1 %v2493_v56 }
 0x1b4   :  { %1109 = vmatpush1.bf16.msra.mxu0 %v2151_v23 }
 0x1b5   :  { %1150 = vmatpush1.bf16.msra.mxu1 %v2154_v24  ;;  %1201 = vmatprep.subr.bf16.mxu0 %v2134_v5 }
 0x1b6   :  { %1242 = vmatprep.subr.bf16.mxu1 %v2138_v22 }
 0x1b7   :  { %1657 = vmatmul.mubr.msk.bf16.vlgmr.msra.gmra.mxu0 %vm666_vm10, %v1656_v27 }
 0x1b8   :  { %1202 = vmatpush1.bf16.msra.mxu0 %v2136_v7  ;;  %1658 = vmatmul.mubr.msk.bf16.vlgmr.msra.gmra.mxu1 %vm666_vm10, %v1656_v27 }
 0x1b9   :  { %1203 = vmatprep.subr.bf16.mxu0 %v2140_v52  ;;  %1243 = vmatpush1.bf16.msra.mxu1 %v2142_v44 }
 0x1ba   :  { %1244 = vmatprep.subr.bf16.mxu1 %v2145_v4  ;;  %1221 = vmatprep.mubr.bf16.mxu0 %v2493_v56 }
 0x1bb   :  { %1262 = vmatprep.mubr.bf16.mxu1 %v2493_v56 }
 0x1bc   :  { %1204 = vmatpush1.bf16.msra.mxu0 %v2151_v23 }
 0x1bd   :  { %1245 = vmatpush1.bf16.msra.mxu1 %v2154_v24  ;;  %1308 = vmatprep.subr.bf16.mxu0 %v2134_v5 }
 0x1be   :  { %1349 = vmatprep.subr.bf16.mxu1 %v2138_v22 }
 0x1bf   :  { %1660 = vmatmul.mubr.msk.bf16.vlgmr.msra.gmra.mxu0 %vm666_vm10, %v1659_v62 }
 0x1c0   :  { %1309 = vmatpush1.bf16.msra.mxu0 %v2136_v7  ;;  %1661 = vmatmul.mubr.msk.bf16.vlgmr.msra.gmra.mxu1 %vm666_vm10, %v1659_v62 }
 0x1c1   :  { %1310 = vmatprep.subr.bf16.mxu0 %v2140_v52  ;;  %1350 = vmatpush1.bf16.msra.mxu1 %v2142_v44 }
 0x1c2   :  { %1351 = vmatprep.subr.bf16.mxu1 %v2145_v4  ;;  %1328 = vmatprep.mubr.bf16.mxu0 %v2493_v56 }
 0x1c3   :  { %1369 = vmatprep.mubr.bf16.mxu1 %v2493_v56 }
 0x1c4   :  { %1311 = vmatpush1.bf16.msra.mxu0 %v2151_v23 }
 0x1c5   :  { %1352 = vmatpush1.bf16.msra.mxu1 %v2154_v24  ;;  %1415 = vmatprep.subr.bf16.mxu0 %v2134_v5 }
 0x1c6   :  { %1456 = vmatprep.subr.bf16.mxu1 %v2138_v22 }
 0x1c7   :  { %1663 = vmatmul.mubr.msk.bf16.vlgmr.msra.gmra.mxu0 %vm666_vm10, %v1662_v10 }
 0x1c8   :  { %1416 = vmatpush1.bf16.msra.mxu0 %v2136_v7  ;;  %1664 = vmatmul.mubr.msk.bf16.vlgmr.msra.gmra.mxu1 %vm666_vm10, %v1662_v10 }
 0x1c9   :  { %1417 = vmatprep.subr.bf16.mxu0 %v2140_v52  ;;  %1457 = vmatpush1.bf16.msra.mxu1 %v2142_v44 }
 0x1ca   :  { %1458 = vmatprep.subr.bf16.mxu1 %v2145_v4  ;;  %1435 = vmatprep.mubr.bf16.mxu0 %v2493_v56 }
 0x1cb   :  { %1476 = vmatprep.mubr.bf16.mxu1 %v2493_v56 }
 0x1cc   :  { %1418 = vmatpush1.bf16.msra.mxu0 %v2151_v23 }
 0x1cd   :  { %1459 = vmatpush1.bf16.msra.mxu1 %v2154_v24  ;;  %1522 = vmatprep.subr.bf16.mxu0 %v2134_v5 }
 0x1ce   :  { %1563 = vmatprep.subr.bf16.mxu1 %v2138_v22 }
 0x1cf   :  { %1666 = vmatmul.mubr.msk.bf16.vlgmr.msra.gmra.mxu0 %vm666_vm10, %v1665_v39 }
 0x1d0   :  { %1523 = vmatpush1.bf16.msra.mxu0 %v2136_v7  ;;  %1667 = vmatmul.mubr.msk.bf16.vlgmr.msra.gmra.mxu1 %vm666_vm10, %v1665_v39 }
 0x1d1   :  { %1524 = vmatprep.subr.bf16.mxu0 %v2140_v52  ;;  %1564 = vmatpush1.bf16.msra.mxu1 %v2142_v44 }
 0x1d2   :  { %1565 = vmatprep.subr.bf16.mxu1 %v2145_v4  ;;  %1542 = vmatprep.mubr.bf16.mxu0 %v2493_v56 }
 0x1d3   :  { %1583 = vmatprep.mubr.bf16.mxu1 %v2493_v56 }
 0x1d4   :  { %1525 = vmatpush1.bf16.msra.mxu0 %v2151_v23 }
 0x1d5   :  { %1566 = vmatpush1.bf16.msra.mxu1 %v2154_v24 }
 0x1d7   :  { %1669 = vmatmul.mubr.msk.bf16.vlgmr.msra.gmra.mxu0 %vm666_vm10, %v1668_v9 }
 0x1d8   :  { %1670 = vmatmul.mubr.msk.bf16.vlgmr.msra.gmra.mxu1 %vm666_vm10, %v1668_v9 }
 0x257   :  { %v704_v48 = vpop.f32.mrf.mxu0 }
 0x258   :  { %752 = vrot.lane.b32.xlu1 %v704_v48, %s1698_s12  ;;  %v745_v21 = vpop.f32.mrf.mxu1 }
 0x259   :  { %v706_v6 = vpop.f32.mrf.mxu0 }
 0x25a   :  { %754 = vrot.lane.b32.xlu0 %v706_v6, %s1698_s12  ;;  %v747_v26 = vpop.f32.mrf.mxu1 }
 0x25b   :  { %v708_v31 = vpop.f32.mrf.mxu0 }
 0x25c   :  { %756 = vrot.lane.b32.xlu1 %v745_v21, %s1698_s12  ;;  %v749_v33 = vpop.f32.mrf.mxu1 }
 0x25d   :  { %v709_v34 = vpop.f32.mrf.mxu0 }
 0x25e   :  { %758 = vrot.lane.b32.xlu0 %v747_v26, %s1698_s12  ;;  %v750_v28 = vpop.f32.mrf.mxu1 }
 0x25f   :  { %v807_v38 = vpop.f32.mrf.mxu0 }
 0x260   :  { %855 = vrot.lane.b32.xlu1 %v807_v38, %s1696_s11  ;;  %v848_v14 = vpop.f32.mrf.mxu1 }
 0x261   :  { %v809_v37 = vpop.f32.mrf.mxu0 }
 0x262   :  { %857 = vrot.lane.b32.xlu0 %v809_v37, %s1696_s11  ;;  %v850_v1 = vpop.f32.mrf.mxu1 }
 0x263   :  { %v811_v18 = vpop.f32.mrf.mxu0 }
 0x264   :  { %859 = vrot.lane.b32.xlu1 %v848_v14, %s1696_s11  ;;  %v852_v35 = vpop.f32.mrf.mxu1 }
 0x265   :  { %v812_v0 = vpop.f32.mrf.mxu0 }
 0x266   :  { %861 = vrot.lane.b32.xlu0 %v850_v1, %s1696_s11  ;;  %v853_v5 = vpop.f32.mrf.mxu1 }
 0x267   :  { %v914_v43 = vpop.f32.mrf.mxu0 }
 0x268   :  { %962 = vrot.lane.b32.xlu1 %v914_v43, %s1695_s10  ;;  %v955_v45 = vpop.f32.mrf.mxu1 }
 0x269   :  { %v916_v7 = vpop.f32.mrf.mxu0 }
 0x26a   :  { %964 = vrot.lane.b32.xlu0 %v916_v7, %s1695_s10  ;;  %v957_v22 = vpop.f32.mrf.mxu1 }
 0x26b   :  { %v918_v50 = vpop.f32.mrf.mxu0 }
 0x26c   :  { %966 = vrot.lane.b32.xlu1 %v955_v45, %s1695_s10  ;;  %v959_v61 = vpop.f32.mrf.mxu1 }
 0x26d   :  { %v919_v52 = vpop.f32.mrf.mxu0 }
 0x26e   :  { %968 = vrot.lane.b32.xlu0 %v957_v22, %s1695_s10  ;;  %v960_v44 = vpop.f32.mrf.mxu1 }
 0x26f   :  { %v1021_v25 = vpop.f32.mrf.mxu0 }
 0x270   :  { %1069 = vrot.lane.b32.xlu1 %v1021_v25, %s1694_s9  ;;  %v1062_v4 = vpop.f32.mrf.mxu1 }
 0x271   :  { %v1023_v23 = vpop.f32.mrf.mxu0 }
 0x272   :  { %1071 = vrot.lane.b32.xlu0 %v1023_v23, %s1694_s9  ;;  %v1064_v24 = vpop.f32.mrf.mxu1 }
 0x273   :  { %v1025_v51 = vpop.f32.mrf.mxu0 }
 0x274   :  { %1073 = vrot.lane.b32.xlu1 %v1062_v4, %s1694_s9  ;;  %v1066_v56 = vpop.f32.mrf.mxu1 }
 0x275   :  { %v1026_v58 = vpop.f32.mrf.mxu0 }
 0x276   :  { %1075 = vrot.lane.b32.xlu0 %v1064_v24, %s1694_s9  ;;  %v1067_v19 = vpop.f32.mrf.mxu1 }
 0x277   :  { %v2299_v20 = vpop.f32.mrf.mxu0 }
 0x278   :  { %v2301_v27 = vpop.f32.mrf.mxu1 }
 0x279   :  { %v2303_v62 = vpop.f32.mrf.mxu0 }
 0x27a   :  { %v2305_v10 = vpop.f32.mrf.mxu1 }
 0x27b   :  { %v1132_v39 = vpop.f32.mrf.mxu0 }
 0x27c   :  { %v1173_v9 = vpop.f32.mrf.mxu1  ;;  %v1612_v39 = vld [vmem:[%s2467_s5] sm:$0xff] }
 0x27d   :  { %v1133_v48 = vpop.f32.mrf.mxu0 }
 0x27e   :  { %v1174_v21 = vpop.f32.mrf.mxu1 }
 0x27f   :  { %v1223_v6 = vpop.f32.mrf.mxu0 }
 0x280   :  { %1271 = vrot.lane.b32.xlu1 %v1223_v6, %s1693_s8  ;;  %v1264_v26 = vpop.f32.mrf.mxu1 }
 0x281   :  { %v1225_v31 = vpop.f32.mrf.mxu0 }
 0x282   :  { %1273 = vrot.lane.b32.xlu0 %v1225_v31, %s1693_s8  ;;  %v1266_v33 = vpop.f32.mrf.mxu1 }
 0x283   :  { %v1227_v34 = vpop.f32.mrf.mxu0 }
 0x284   :  { %1275 = vrot.lane.b32.xlu1 %v1264_v26, %s1693_s8  ;;  %v1268_v28 = vpop.f32.mrf.mxu1 }
 0x285   :  { %v1228_v38 = vpop.f32.mrf.mxu0 }
 0x286   :  { %1277 = vrot.lane.b32.xlu0 %v1266_v33, %s1693_s8  ;;  %v1269_v14 = vpop.f32.mrf.mxu1 }
 0x287   :  { %v1330_v37 = vpop.f32.mrf.mxu0 }
 0x288   :  { %1378 = vrot.lane.b32.xlu1 %v1330_v37, %s1692_s7  ;;  %v1371_v1 = vpop.f32.mrf.mxu1 }
 0x289   :  { %v1332_v18 = vpop.f32.mrf.mxu0 }
 0x28a   :  { %1380 = vrot.lane.b32.xlu0 %v1332_v18, %s1692_s7  ;;  %v1373_v35 = vpop.f32.mrf.mxu1 }
 0x28b   :  { %v1334_v0 = vpop.f32.mrf.mxu0 }
 0x28c   :  { %1382 = vrot.lane.b32.xlu1 %v1371_v1, %s1692_s7  ;;  %v1375_v5 = vpop.f32.mrf.mxu1 }
 0x28d   :  { %v1335_v43 = vpop.f32.mrf.mxu0 }
 0x28e   :  { %1384 = vrot.lane.b32.xlu0 %v1373_v35, %s1692_s7  ;;  %v1376_v45 = vpop.f32.mrf.mxu1 }
 0x28f   :  { %v1437_v7 = vpop.f32.mrf.mxu0 }
 0x290   :  { %1485 = vrot.lane.b32.xlu1 %v1437_v7, %s1691_s30  ;;  %v1478_v22 = vpop.f32.mrf.mxu1 }
 0x291   :  { %v1439_v50 = vpop.f32.mrf.mxu0 }
 0x292   :  { %1487 = vrot.lane.b32.xlu0 %v1439_v50, %s1691_s30  ;;  %v1480_v61 = vpop.f32.mrf.mxu1 }
 0x293   :  { %v1441_v52 = vpop.f32.mrf.mxu0 }
 0x294   :  { %1489 = vrot.lane.b32.xlu1 %v1478_v22, %s1691_s30  ;;  %v1482_v44 = vpop.f32.mrf.mxu1 }
 0x295   :  { %v1442_v25 = vpop.f32.mrf.mxu0 }
 0x296   :  { %1491 = vrot.lane.b32.xlu0 %v1480_v61, %s1691_s30  ;;  %v1483_v4 = vpop.f32.mrf.mxu1 }
 0x297   :  { %v1544_v23 = vpop.f32.mrf.mxu0 }
 0x298   :  { %1592 = vrot.lane.b32.xlu1 %v1544_v23, %s1690_s25  ;;  %v1585_v24 = vpop.f32.mrf.mxu1 }
 0x299   :  { %v1546_v51 = vpop.f32.mrf.mxu0 }
 0x29a   :  { %1594 = vrot.lane.b32.xlu0 %v1546_v51, %s1690_s25  ;;  %v1587_v56 = vpop.f32.mrf.mxu1 }
 0x29b   :  { %v1548_v58 = vpop.f32.mrf.mxu0 }
 0x29c   :  { %1596 = vrot.lane.b32.xlu1 %v1585_v24, %s1690_s25  ;;  %v1589_v19 = vpop.f32.mrf.mxu1 }
 0x29d   :  { %v1549_v9 = vpop.f32.mrf.mxu0 }
 0x29e   :  { %1598 = vrot.lane.b32.xlu0 %v1587_v56, %s1690_s25  ;;  %v1590_v48 = vpop.f32.mrf.mxu1 }
 0x2a0   :  { %1615 = vperm.xlu1 %1683, %v1612_v39  }
 0x2ca   :  { %v753_v21 = vpop.permute.xlu1 %752 }
 0x2cc   :  { %v755_v6 = vpop.permute.xlu0 %754 }
 0x2cd   :  { %v762_v51 = vsel %vm39_vm8, %v753_v21, %v755_v6 }
 0x2ce   :  { %v757_v26 = vpop.permute.xlu1 %756 }
 0x2cf   :  { %v761_v56 = vsel %vm39_vm8, %v755_v6, %v757_v26 }
 0x2d0   :  { %v759_v31 = vpop.permute.xlu0 %758 }
 0x2d1   :  { %v760_v58 = vsel %vm39_vm8, %v757_v26, %v759_v31  ;;  %v763_v19 = vsel %vm39_vm8, %v759_v31, %v753_v21 }
 0x2d2   :  { %v856_v33 = vpop.permute.xlu1 %855 }
 0x2d4   :  { %v858_v34 = vpop.permute.xlu0 %857 }
 0x2d5   :  { %v865_v44 = vsel %vm82_vm7, %v856_v33, %v858_v34 }
 0x2d6   :  { %v860_v28 = vpop.permute.xlu1 %859  ;;  %v868_v39 = vmul.f32 %v865_v44, %v2058_v8  ;;  %v765_v8 = vmul.f32 %v762_v51, %v2094_v46 }
 0x2d7   :  { %v864_v25 = vsel %vm82_vm7, %v858_v34, %v860_v28 }
 0x2d8   :  { %v862_v38 = vpop.permute.xlu0 %861  ;;  %v869_v9 = vmul.f32 %v864_v25, %v2081_v60  ;;  %v766_v60 = vmul.f32 %v761_v56, %v2106_v47  ;;  %v872_v44 = vadd.f32 %v868_v39, %v765_v8  ;;  %v2494_v8 = vld [vmem:[#allocation11_spill] sm:$0xff] }
 0x2d9   :  { %v863_v4 = vsel %vm82_vm7, %v860_v28, %v862_v38  ;;  %v866_v23 = vsel %vm82_vm7, %v862_v38, %v856_v33 }
 0x2da   :  { %v963_v14 = vpop.permute.xlu1 %962  ;;  %v867_v48 = vmul.f32 %v866_v23, %v2079_v59  ;;  %v870_v33 = vmul.f32 %v863_v4, %v2084_v63  ;;  %v764_v59 = vmul.f32 %v763_v19, %v2103_v41  ;;  %v767_v63 = vmul.f32 %v760_v58, %v2109_v2 }
 0x2db   :  { %v873_v25 = vadd.f32 %v869_v9, %v766_v60  ;;  %v2495_v60 = vld [vmem:[#allocation12_spill] sm:$0xff] }
 0x2dc   :  { %v965_v37 = vpop.permute.xlu0 %964  ;;  %v871_v4 = vadd.f32 %v867_v48, %v764_v59  ;;  %v874_v23 = vadd.f32 %v870_v33, %v767_v63  ;;  %v1176_v33 = vmul.f32 %v2299_v20, %v1921_v15  ;;  %v2496_v63 = vld [vmem:[#allocation10_spill] sm:$0xff] }
 0x2dd   :  { %v972_v28 = vsel %vm119_vm6, %v963_v14, %v965_v37 }
 0x2de   :  { %v967_v1 = vpop.permute.xlu1 %966  ;;  %v975_v46 = vmul.f32 %v972_v28, %v2041_v3  ;;  %v1177_v28 = vmul.f32 %v2303_v62, %v1955_v42 }
 0x2df   :  { %v971_v6 = vsel %vm119_vm6, %v965_v37, %v967_v1 }
 0x2e0   :  { %v969_v18 = vpop.permute.xlu0 %968  ;;  %v976_v47 = vmul.f32 %v971_v6, %v2053_v53  ;;  %v1178_v6 = vmul.f32 %v2301_v27, %v1968_v57 }
 0x2e1   :  { %v970_v26 = vsel %vm119_vm6, %v967_v1, %v969_v18  ;;  %v973_v21 = vsel %vm119_vm6, %v969_v18, %v963_v14 }
 0x2e2   :  { %v1070_v35 = vpop.permute.xlu1 %1069  ;;  %v974_v41 = vmul.f32 %v973_v21, %v2051_v40  ;;  %v977_v2 = vmul.f32 %v970_v26, %v2055_v54  ;;  %v980_v53 = vadd.f32 %v976_v47, %v873_v25  ;;  %v1179_v26 = vmul.f32 %v2305_v10, %v1966_v49  ;;  %v2498_v25 = vld [vmem:[#allocation7_spill] sm:$0xff] }
 0x2e4   :  { %v1072_v0 = vpop.permute.xlu0 %1071  ;;  %v978_v56 = vadd.f32 %v974_v41, %v871_v4  ;;  %v981_v40 = vadd.f32 %v977_v2, %v874_v23  ;;  %v2499_v4 = vld [vmem:[#allocation9_spill] sm:$0xff] }
 0x2e5   :  { %v1079_v38 = vsel %vm162_vm5, %v1070_v35, %v1072_v0 }
 0x2e6   :  { %v1074_v5 = vpop.permute.xlu1 %1073 }
 0x2e7   :  { %v1078_v37 = vsel %vm162_vm5, %v1072_v0, %v1074_v5  ;;  %v1082_v0 = vmul.f32 %v1079_v38, %v1994_v36 }
 0x2e8   :  { %v1076_v43 = vpop.permute.xlu0 %1075 }
 0x2e9   :  { %v1077_v1 = vsel %vm162_vm5, %v1074_v5, %v1076_v43  ;;  %v1080_v14 = vsel %vm162_vm5, %v1076_v43, %v1070_v35  ;;  %v1083_v5 = vmul.f32 %v1078_v37, %v2017_v55  ;;  %v979_v43 = vadd.f32 %v975_v46, %v872_v44 }
 0x2ea   :  { %v1081_v51 = vmul.f32 %v1080_v14, %v2014_v16  ;;  %v1084_v35 = vmul.f32 %v1077_v1, %v2020_v17 }
 0x2eb   :  { %v1086_v54 = vadd.f32 %v1082_v0, %v979_v43  ;;  %v1087_v19 = vadd.f32 %v1083_v5, %v980_v53  ;;  %v2500_v0 = vld [vmem:[#allocation6_spill] sm:$0xff]  ;;  %v2501_v53 = vld [vmem:[#allocation3_spill] sm:$0xff] }
 0x2ec   :  { %v1085_v39 = vadd.f32 %v1081_v51, %v978_v56  ;;  %v1088_v9 = vadd.f32 %v1084_v35, %v981_v40  ;;  %v2502_v40 = vld [vmem:[#allocation4_spill] sm:$0xff] }
 0x2ed   :  { %v1181_v10 = vadd.f32 %v1177_v28, %v1086_v54  ;;  %v2503_v54 = vld [vmem:[#allocation2_spill] sm:$0xff] }
 0x2ee   :  { %v1180_v62 = vadd.f32 %v1176_v33, %v1085_v39 }
 0x2f2   :  { %v1272_v45 = vpop.permute.xlu1 %1271 }
 0x2f4   :  { %v1274_v7 = vpop.permute.xlu0 %1273 }
 0x2f5   :  { %v1281_v36 = vsel %vm229_vm4, %v1272_v45, %v1274_v7 }
 0x2f6   :  { %v1276_v22 = vpop.permute.xlu1 %1275  ;;  %v1283_v57 = vmul.f32 %v1281_v36, %v1939_v29 }
 0x2f7   :  { %v1280_v55 = vsel %vm229_vm4, %v1274_v7, %v1276_v22 }
 0x2f8   :  { %v1278_v50 = vpop.permute.xlu0 %1277  ;;  %v1284_v49 = vmul.f32 %v1280_v55, %v1944_v32  ;;  %v1287_v38 = vadd.f32 %v1283_v57, %v1180_v62  ;;  %v1687_v57 = vld [vmem:[%s2462_s0 + $0x8] sm:$0xff]  ;;  %v1689_v62 = vld [vmem:[%s2462_s0 + $0x18] sm:$0xff] }
 0x2f9   :  { %v1279_v16 = vsel %vm229_vm4, %v1276_v22, %v1278_v50  ;;  %v1282_v17 = vsel %vm229_vm4, %v1278_v50, %v1272_v45  ;;  %v1182_v22 = vadd.f32 %v1178_v6, %v1087_v19  ;;  %v1183_v50 = vadd.f32 %v1179_v26, %v1088_v9 }
 0x2fa   :  { %v2326_v61 = vpop.permute.xlu1 %1378  ;;  %v1285_v20 = vmul.f32 %v1279_v16, %v1972_v11  ;;  %v1286_v27 = vmul.f32 %v1282_v17, %v1941_v30  ;;  %v1288_v37 = vadd.f32 %v1284_v49, %v1181_v10 }
 0x2fc   :  { %v2328_v52 = vpop.permute.xlu0 %1380  ;;  %v1289_v1 = vadd.f32 %v1285_v20, %v1182_v22  ;;  %v1290_v14 = vadd.f32 %v1286_v27, %v1183_v50  ;;  %v1688_v20 = vld [vmem:[%s2462_s0 + $0x10] sm:$0xff] }
 0x2fd   :  { %v1388_v7 = vsel %vm266_vm3, %v2326_v61, %v2328_v52 }
 0x2fe   :  { %v1383_v24 = vpop.permute.xlu1 %1382 }
 0x2ff   :  { %v1387_v45 = vsel %vm266_vm3, %v2328_v52, %v1383_v24  ;;  %v1390_v52 = vmul.f32 %v1388_v7, %v1919_v12 }
 0x300   :  { %v1385_v34 = vpop.permute.xlu0 %1384 }
 0x301   :  { %v1386_v15 = vsel %vm266_vm3, %v1383_v24, %v1385_v34  ;;  %v1389_v42 = vsel %vm266_vm3, %v1385_v34, %v2326_v61  ;;  %v1391_v24 = vmul.f32 %v1387_v45, %v2494_v8  ;;  %v1394_v51 = vadd.f32 %v1390_v52, %v1287_v38 }
 0x302   :  { %v1486_v31 = vpop.permute.xlu1 %1485  ;;  %v1392_v59 = vmul.f32 %v1386_v15, %v2495_v60  ;;  %v1393_v61 = vmul.f32 %v1389_v42, %v2496_v63  ;;  %v1686_v15 = vld [vmem:[%s2462_s0] sm:$0xff] }
 0x303   :  { %v1395_v35 = vadd.f32 %v1391_v24, %v1288_v37 }
 0x304   :  { %v1488_v18 = vpop.permute.xlu0 %1487  ;;  %v1397_v43 = vadd.f32 %v1393_v61, %v1290_v14 }
 0x305   :  { %v1495_v32 = vsel %vm309_vm2, %v1486_v31, %v1488_v18 }
 0x306   :  { %v1490_v3 = vpop.permute.xlu1 %1489 }
 0x307   :  { %v1494_v30 = vsel %vm309_vm2, %v1488_v18, %v1490_v3  ;;  %v2497_v18 = vld [vmem:[#allocation8_spill] sm:$0xff] }
 0x308   :  { %v1492_v58 = vpop.permute.xlu0 %1491  ;;  %v1497_v44 = vmul.f32 %v1495_v32, %v2497_v18 }
 0x309   :  { %v1493_v11 = vsel %vm309_vm2, %v1490_v3, %v1492_v58  ;;  %v1496_v12 = vsel %vm309_vm2, %v1492_v58, %v1486_v31  ;;  %v1498_v31 = vmul.f32 %v1494_v30, %v2498_v25  ;;  %v1396_v3 = vadd.f32 %v1392_v59, %v1289_v1 }
 0x30a   :  { %v1593_v48 = vpop.permute.xlu1 %1592  ;;  %v1499_v23 = vmul.f32 %v1493_v11, %v2499_v4  ;;  %v1500_v5 = vmul.f32 %v1496_v12, %v2500_v0  ;;  %v1501_v9 = vadd.f32 %v1497_v44, %v1394_v51 }
 0x30c   :  { %v1595_v21 = vpop.permute.xlu0 %1594  ;;  %v1503_v36 = vadd.f32 %v1499_v23, %v1396_v3  ;;  %v1504_v55 = vadd.f32 %v1500_v5, %v1397_v43 }
 0x30d   :  { %v1602_v46 = vsel %vm346_vm0, %v1593_v48, %v1595_v21 }
 0x30e   :  { %v1597_v34 = vpop.permute.xlu1 %1596  ;;  %v1604_v56 = vmul.f32 %v1602_v46, %v2501_v53 }
 0x30f   :  { %v1601_v47 = vsel %vm346_vm0, %v1595_v21, %v1597_v34 }
 0x310   :  { %v1599_v29 = vpop.permute.xlu0 %1598  ;;  %v1605_v58 = vmul.f32 %v1601_v47, %v2502_v40  ;;  %v1608_v16 = vadd.f32 %v1604_v56, %v1501_v9 }
 0x311   :  { %v1600_v41 = vsel %vm346_vm0, %v1597_v34, %v1599_v29  ;;  %v1603_v2 = vsel %vm346_vm0, %v1599_v29, %v1593_v48  ;;  %v1502_v48 = vadd.f32 %v1498_v31, %v1395_v35 }
 0x312   :  { %v1606_v19 = vmul.f32 %v1600_v41, %v2503_v54  ;;  %v1607_v39 = vmul.f32 %v1603_v2, %v2504_v13 }
 0x313   :  { %v1609_v17 = vadd.f32 %v1605_v58, %v1502_v48 }
 0x314   :  { %v1610_v33 = vadd.f32 %v1606_v19, %v1503_v36  ;;  %v1611_v28 = vadd.f32 %v1607_v39, %v1504_v55 }
 0x31b   :  { %v1616_v6 = vpop.permute.xlu1 %1615 }
 0x31c   :  { %v1618_v26 = vadd.f32 %v1616_v6, %v1608_v16  ;;  %v1619_v21 = vadd.f32 %v1616_v6, %v1609_v17  ;;  %v1620_v7 = vadd.f32 %v1616_v6, %v1610_v33  ;;  %v1621_v45 = vadd.f32 %v1616_v6, %v1611_v28 }
 0x31e   :  { %v1622_v42 = vadd.f32 %v1686_v15, %v1618_v26  ;;  %v1623_v49 = vadd.f32 %v1687_v57, %v1619_v21  ;;  %v1624_v27 = vadd.f32 %v1688_v20, %v1620_v7  ;;  %v1625_v10 = vadd.f32 %v1689_v62, %v1621_v45 }
 0x320   :  { %1626 = vst [vmem:[%s2468_s6] sm:$0xff] %v1622_v42  ;;  %1627 = vst [vmem:[%s2468_s6 + $0x8] sm:$0xff] %v1623_v49 }
 0x321   :  { %1671 = vst [vmem:[%s2468_s6 + $0x10] sm:$0xff] %v1624_v27  ;;  %1672 = vst [vmem:[%s2468_s6 + $0x18] sm:$0xff] %v1625_v10 }

</bundles_post_ra>
